<compile_context>
chip_gen: v7x
topology: tpu7x:2x2x1
jax: 0.10.0
libtpu: 0.0.40
codegen_flags: <defaults>
</compile_context>

<pallas_src>
import jax
import jax.numpy as jnp
from jax import lax
from jax.experimental import pallas as pl
from jax.experimental.pallas import tpu as pltpu


H1_PAD = 512    # hidden1: 400 -> 512
H2_PAD = 384    # hidden2: 300 -> 384
OUT_PAD = 8     # output rows: 1 -> 8 (sublane-aligned; row 0 is the Q value)


def critic_ddpg_kernel(s_ref, a_ref,
                       w1_ref, b1_ref,
                       w2s_ref, w2a_ref, b2_ref,
                       w3_ref, b3_ref,
                       out_ref):
    # ---- linear1 + relu (f32):  q_T = relu(W1 @ state^T + b1)  -> (H1, bb)
    q = lax.dot_general(w1_ref[...], s_ref[...],
                        (((1,), (1,)), ((), ())),
                        preferred_element_type=jnp.float32)
    q = jnp.maximum(q + b1_ref[...], 0.0)

    # ---- linear2 + relu (bf16 weights, f32 accumulation):
    #      concat([q, action], 1) @ W2^T  ==  W2s @ q_T + W2a @ action^T
    h = jnp.dot(w2s_ref[...], q.astype(jnp.bfloat16),
                preferred_element_type=jnp.float32)
    h = h + lax.dot_general(w2a_ref[...], a_ref[...].astype(jnp.bfloat16),
                            (((1,), (1,)), ((), ())),
                            preferred_element_type=jnp.float32)
    h = jnp.maximum(h + b2_ref[...], 0.0)

    # ---- linear3 (f32):  out_T = W3 @ h_T + b3  -> (8, bb); row 0 = Q(s, a)
    out = jnp.dot(w3_ref[...], h, preferred_element_type=jnp.float32)
    out_ref[...] = out + b3_ref[...]


def init_params(key, state_space, action_space):
    """PyTorch-style nn.Linear init; weights kept in torch (out, in) layout."""
    def linear(key, fan_in, fan_out):
        kw, kb = jax.random.split(key)
        bound = 1.0 / jnp.sqrt(fan_in)
        w = jax.random.uniform(kw, (fan_out, fan_in), jnp.float32, -bound, bound)
        b = jax.random.uniform(kb, (fan_out,), jnp.float32, -bound, bound)
        return w, b

    k1, k2, k3 = jax.random.split(key, 3)
    w1, b1 = linear(k1, state_space, 400)
    w2, b2 = linear(k2, 400 + action_space, 300)
    w3, b3 = linear(k3, 300, 1)
    return {"w1": w1, "b1": b1, "w2": w2, "b2": b2, "w3": w3, "b3": b3}


def prepare_params(raw):
    """One-time conversion: split / pad / cast.  Do NOT call per forward step."""
    w1, b1, w2, b2, w3, b3 = (raw[k] for k in
                              ("w1", "b1", "w2", "b2", "w3", "b3"))
    hidden1 = w1.shape[0]                 # 400
    # torch.cat([q, action], 1) @ W2^T == W2[:, :400] @ q^T + W2[:, 400:] @ a^T
    w2_s, w2_a = w2[:, :hidden1], w2[:, hidden1:]

    def pad2(x, rows, cols):
        return jnp.pad(x, ((0, rows - x.shape[0]), (0, cols - x.shape[1])))

    return {
        # layers 1 and 3 stay f32 (tiny; keeps parity with the f32 module)
        "w1":   pad2(w1, H1_PAD, w1.shape[1]),
        "b1":   pad2(b1.reshape(-1, 1), H1_PAD, 1),
        # layer 2 carries the big weight: bf16 halves its HBM->VMEM traffic
        "w2_s": pad2(w2_s, H2_PAD, H1_PAD).astype(jnp.bfloat16),
        "w2_a": pad2(w2_a, H2_PAD, w2_a.shape[1]).astype(jnp.bfloat16),
        "b2":   pad2(b2.reshape(-1, 1), H2_PAD, 1),
        "w3":   pad2(w3, OUT_PAD, H2_PAD),
        "b3":   pad2(b3.reshape(-1, 1), OUT_PAD, 1),
    }


def _round_up(x, m):
    return ((x + m - 1) // m) * m


def critic_ddpg_forward(state, action, p, *, block_b=1024):
    """state: (B, S) f32, action: (B, A) f32  ->  (B, 1) f32 Q-values."""
    B, S = state.shape
    A = action.shape[1]

    if B <= block_b:
        bb = _round_up(max(B, 1), 128)            # lane-aligned single block
    else:
        # clamp the block so the "parallel" grid has >= 2 steps (v7x: 2 TCs)
        bb = min(block_b, _round_up(-(-B // 2), 128))
    Bp = _round_up(B, bb)

    if Bp != B:
        state = jnp.pad(state, ((0, Bp - B), (0, 0)))
        action = jnp.pad(action, ((0, Bp - B), (0, 0)))

    flops = 2 * Bp * (S * H1_PAD + H1_PAD * H2_PAD + A * H2_PAD
                      + H2_PAD * OUT_PAD)
    bytes_accessed = (
        state.size * 4 + action.size * 4 + OUT_PAD * Bp * 4
        + 4 * (p["w1"].size + p["w3"].size)
        + 2 * (p["w2_s"].size + p["w2_a"].size)
        + 4 * (p["b1"].size + p["b2"].size + p["b3"].size))

    out = pl.pallas_call(
        critic_ddpg_kernel,
        out_shape=jax.ShapeDtypeStruct((OUT_PAD, Bp), jnp.float32),
        grid=(Bp // bb,),
        in_specs=[
            pl.BlockSpec((bb, S), lambda i: (i, 0)),             # state
            pl.BlockSpec((bb, A), lambda i: (i, 0)),             # action
            pl.BlockSpec((H1_PAD, S), lambda i: (0, 0)),         # w1 (f32)
            pl.BlockSpec((H1_PAD, 1), lambda i: (0, 0)),         # b1
            pl.BlockSpec((H2_PAD, H1_PAD), lambda i: (0, 0)),    # w2_s (bf16)
            pl.BlockSpec((H2_PAD, A), lambda i: (0, 0)),         # w2_a (bf16)
            pl.BlockSpec((H2_PAD, 1), lambda i: (0, 0)),         # b2
            pl.BlockSpec((OUT_PAD, H2_PAD), lambda i: (0, 0)),   # w3 (f32)
            pl.BlockSpec((OUT_PAD, 1), lambda i: (0, 0)),        # b3
        ],
        out_specs=pl.BlockSpec((OUT_PAD, bb), lambda i: (0, i)),
        compiler_params=pltpu.CompilerParams(
            dimension_semantics=("parallel",)),
        cost_estimate=pl.CostEstimate(
            flops=flops, transcendentals=0, bytes_accessed=bytes_accessed),
    )(state, action,
      p["w1"], p["b1"], p["w2_s"], p["w2_a"], p["b2"], p["w3"], p["b3"])

    # row 0 of the (8, Bp) feature-major output holds Q(s, a)
    return out[0, :B].reshape(B, 1)


def _reference_kernel_math(state, action, p):
    """Plain-JAX replica of the kernel arithmetic (same padding / dtypes)."""
    qT = lax.dot_general(p["w1"], state, (((1,), (1,)), ((), ())),
                         preferred_element_type=jnp.float32)
    qT = jnp.maximum(qT + p["b1"], 0.0)
    hT = jnp.dot(p["w2_s"], qT.astype(jnp.bfloat16),
                 preferred_element_type=jnp.float32)
    hT = hT + lax.dot_general(p["w2_a"], action.astype(jnp.bfloat16),
                              (((1,), (1,)), ((), ())),
                              preferred_element_type=jnp.float32)
    hT = jnp.maximum(hT + p["b2"], 0.0)
    oT = jnp.dot(p["w3"], hT, preferred_element_type=jnp.float32) + p["b3"]
    return oT[0, :].reshape(-1, 1)


def _reference_f32(state, action, raw):
    """Direct f32 replica of the PyTorch Critic_DDPG.forward."""
    q = jnp.maximum(state @ raw["w1"].T + raw["b1"], 0.0)
    q = jnp.maximum(
        jnp.concatenate([q, action], axis=1) @ raw["w2"].T + raw["b2"], 0.0)
    return q @ raw["w3"].T + raw["b3"]


if __name__ == "__main__":
    batch = 4
    state_space = 16
    action_space = 4

    key = jax.random.PRNGKey(0)
    kp, ks, ka = jax.random.split(key, 3)
    raw = init_params(kp, state_space, action_space)
    prepared = prepare_params(raw)

    state = jax.random.normal(ks, (batch, state_space), jnp.float32)
    action = jax.random.normal(ka, (batch, action_space), jnp.float32)

    q_pallas = critic_ddpg_forward(state, action, prepared)
    jax.block_until_ready(q_pallas)
    assert q_pallas.shape == (batch, 1)

    # check against a plain-JAX replica of the exact kernel math
    q_ref = _reference_kernel_math(state, action, prepared)
    assert jnp.allclose(q_pallas, q_ref, atol=1e-2, rtol=1e-2), \
        "mismatch vs kernel-math reference"

    # check against the original f32 (unpadded, torch-equivalent) formulation
    q32 = _reference_f32(state, action, raw)
    assert jnp.allclose(q_pallas, q32, atol=5e-2, rtol=5e-2), \
        "mismatch vs f32 reference"

    # exercise the multi-block grid path (>= 2 "parallel" steps + batch pad)
    B2 = 1100
    ks2, ka2 = jax.random.split(jax.random.PRNGKey(1))
    s2 = jax.random.normal(ks2, (B2, state_space), jnp.float32)
    a2 = jax.random.normal(ka2, (B2, action_space), jnp.float32)
    q2 = critic_ddpg_forward(s2, a2, prepared)
    jax.block_until_ready(q2)
    assert q2.shape == (B2, 1)
    assert jnp.allclose(q2, _reference_kernel_math(s2, a2, prepared),
                        atol=1e-2, rtol=1e-2), "mismatch on tiled batch"
    assert jnp.allclose(q2, _reference_f32(s2, a2, raw),
                        atol=5e-2, rtol=5e-2), "mismatch vs f32 on tiled batch"

    print("KERNEL_OK")
</pallas_src>

<mosaic_0001>
module attributes {stable_mosaic.version = 11 : i64} {
  func.func @critic_ddpg_kernel(%arg0: i32, %arg1: memref<128x16xf32, #tpu.memory_space<vmem>>, %arg2: memref<128x4xf32, #tpu.memory_space<vmem>>, %arg3: memref<512x16xf32, #tpu.memory_space<vmem>>, %arg4: memref<512x1xf32, #tpu.memory_space<vmem>>, %arg5: memref<384x512xbf16, #tpu.memory_space<vmem>>, %arg6: memref<384x4xbf16, #tpu.memory_space<vmem>>, %arg7: memref<384x1xf32, #tpu.memory_space<vmem>>, %arg8: memref<8x384xf32, #tpu.memory_space<vmem>>, %arg9: memref<8x1xf32, #tpu.memory_space<vmem>>, %arg10: memref<8x128xf32, #tpu.memory_space<vmem>>) attributes {dimension_semantics = [#tpu.dimension_semantics<parallel>], iteration_bounds = array<i64: 1>, scalar_prefetch = 0 : i64, scratch_operands = 0 : i64, tpu.core_type = #tpu.core_type<tc>, window_params = [{transform_indices = @transform_0, window_bounds = array<i64: 128, 16>}, {transform_indices = @transform_1, window_bounds = array<i64: 128, 4>}, {pipeline_mode = #tpu.pipeline_mode<synchronous>, transform_indices = @transform_2, window_bounds = array<i64: 512, 16>}, {pipeline_mode = #tpu.pipeline_mode<synchronous>, transform_indices = @transform_3, window_bounds = array<i64: 512, 1>}, {pipeline_mode = #tpu.pipeline_mode<synchronous>, transform_indices = @transform_4, window_bounds = array<i64: 384, 512>}, {pipeline_mode = #tpu.pipeline_mode<synchronous>, transform_indices = @transform_5, window_bounds = array<i64: 384, 4>}, {pipeline_mode = #tpu.pipeline_mode<synchronous>, transform_indices = @transform_6, window_bounds = array<i64: 384, 1>}, {pipeline_mode = #tpu.pipeline_mode<synchronous>, transform_indices = @transform_7, window_bounds = array<i64: 8, 384>}, {pipeline_mode = #tpu.pipeline_mode<synchronous>, transform_indices = @transform_8, window_bounds = array<i64: 8, 1>}, {transform_indices = @transform_9, window_bounds = array<i64: 8, 128>}]} {
    %c0 = arith.constant 0 : index
    %c0_0 = arith.constant 0 : index
    %0 = vector.load %arg3[%c0, %c0_0] : memref<512x16xf32, #tpu.memory_space<vmem>>, vector<512x16xf32>
    %c0_1 = arith.constant 0 : index
    %c0_2 = arith.constant 0 : index
    %1 = vector.load %arg1[%c0_1, %c0_2] : memref<128x16xf32, #tpu.memory_space<vmem>>, vector<128x16xf32>
    %cst = arith.constant dense<0.000000e+00> : vector<512x128xf32>
    %2 = tpu.matmul %0, %1, %cst {dimension_numbers = #tpu.dot_dimension_numbers<[1], [1], [0], [0], [0, 0, 1, 0], [], []>} : vector<512x16xf32>, vector<128x16xf32>, vector<512x128xf32> -> vector<512x128xf32>
    %c0_3 = arith.constant 0 : index
    %c0_4 = arith.constant 0 : index
    %3 = vector.load %arg4[%c0_3, %c0_4] : memref<512x1xf32, #tpu.memory_space<vmem>>, vector<512x1xf32>
    %4 = vector.broadcast %3 : vector<512x1xf32> to vector<512x128xf32>
    %5 = arith.addf %2, %4 : vector<512x128xf32>
    %cst_5 = arith.constant 0.000000e+00 : f32
    %6 = vector.broadcast %cst_5 : f32 to vector<512x128xf32>
    %7 = arith.maximumf %5, %6 : vector<512x128xf32>
    %c0_6 = arith.constant 0 : index
    %c0_7 = arith.constant 0 : index
    %8 = vector.load %arg5[%c0_6, %c0_7] : memref<384x512xbf16, #tpu.memory_space<vmem>>, vector<384x512xbf16>
    %9 = arith.truncf %7 : vector<512x128xf32> to vector<512x128xbf16>
    %cst_8 = arith.constant dense<0.000000e+00> : vector<384x128xf32>
    %10 = tpu.matmul %8, %9, %cst_8 {dimension_numbers = #tpu.dot_dimension_numbers<[1], [0], [0], [1], [0, 0, 1, 1], [], []>} : vector<384x512xbf16>, vector<512x128xbf16>, vector<384x128xf32> -> vector<384x128xf32>
    %c0_9 = arith.constant 0 : index
    %c0_10 = arith.constant 0 : index
    %11 = vector.load %arg6[%c0_9, %c0_10] : memref<384x4xbf16, #tpu.memory_space<vmem>>, vector<384x4xbf16>
    %c0_11 = arith.constant 0 : index
    %c0_12 = arith.constant 0 : index
    %12 = vector.load %arg2[%c0_11, %c0_12] : memref<128x4xf32, #tpu.memory_space<vmem>>, vector<128x4xf32>
    %13 = arith.truncf %12 : vector<128x4xf32> to vector<128x4xbf16>
    %cst_13 = arith.constant dense<0.000000e+00> : vector<384x128xf32>
    %14 = tpu.matmul %11, %13, %cst_13 {dimension_numbers = #tpu.dot_dimension_numbers<[1], [1], [0], [0], [0, 0, 1, 0], [], []>} : vector<384x4xbf16>, vector<128x4xbf16>, vector<384x128xf32> -> vector<384x128xf32>
    %15 = arith.addf %10, %14 : vector<384x128xf32>
    %c0_14 = arith.constant 0 : index
    %c0_15 = arith.constant 0 : index
    %16 = vector.load %arg7[%c0_14, %c0_15] : memref<384x1xf32, #tpu.memory_space<vmem>>, vector<384x1xf32>
    %17 = vector.broadcast %16 : vector<384x1xf32> to vector<384x128xf32>
    %18 = arith.addf %15, %17 : vector<384x128xf32>
    %cst_16 = arith.constant 0.000000e+00 : f32
    %19 = vector.broadcast %cst_16 : f32 to vector<384x128xf32>
    %20 = arith.maximumf %18, %19 : vector<384x128xf32>
    %c0_17 = arith.constant 0 : index
    %c0_18 = arith.constant 0 : index
    %21 = vector.load %arg8[%c0_17, %c0_18] : memref<8x384xf32, #tpu.memory_space<vmem>>, vector<8x384xf32>
    %cst_19 = arith.constant dense<0.000000e+00> : vector<8x128xf32>
    %22 = tpu.matmul %21, %20, %cst_19 {dimension_numbers = #tpu.dot_dimension_numbers<[1], [0], [0], [1], [0, 0, 1, 1], [], []>} : vector<8x384xf32>, vector<384x128xf32>, vector<8x128xf32> -> vector<8x128xf32>
    %c0_20 = arith.constant 0 : index
    %c0_21 = arith.constant 0 : index
    %23 = vector.load %arg9[%c0_20, %c0_21] : memref<8x1xf32, #tpu.memory_space<vmem>>, vector<8x1xf32>
    %24 = vector.broadcast %23 : vector<8x1xf32> to vector<8x128xf32>
    %25 = arith.addf %22, %24 : vector<8x128xf32>
    %c0_22 = arith.constant 0 : index
    %c0_23 = arith.constant 0 : index
    %26 = vector.load %arg10[%c0_22, %c0_23] : memref<8x128xf32, #tpu.memory_space<vmem>>, vector<8x128xf32>
    tpu.vector_store %arg10[%c0_22, %c0_23], %25 {strides = array<i32>} : memref<8x128xf32, #tpu.memory_space<vmem>>, vector<8x128xf32>,
    return
  }
  func.func @transform_0(%arg0: i32) -> (i32, i32) {
    %c0_i32 = arith.constant 0 : i32
    %c0_i32_0 = arith.constant 0 : i32
    return %arg0, %c0_i32 : i32, i32
  }
  func.func @transform_1(%arg0: i32) -> (i32, i32) {
    %c0_i32 = arith.constant 0 : i32
    %c0_i32_0 = arith.constant 0 : i32
    return %arg0, %c0_i32 : i32, i32
  }
  func.func @transform_2(%arg0: i32) -> (i32, i32) {
    %c0_i32 = arith.constant 0 : i32
    %c0_i32_0 = arith.constant 0 : i32
    %c0_i32_1 = arith.constant 0 : i32
    return %c0_i32, %c0_i32_0 : i32, i32
  }
  func.func @transform_3(%arg0: i32) -> (i32, i32) {
    %c0_i32 = arith.constant 0 : i32
    %c0_i32_0 = arith.constant 0 : i32
    %c0_i32_1 = arith.constant 0 : i32
    return %c0_i32, %c0_i32_0 : i32, i32
  }
  func.func @transform_4(%arg0: i32) -> (i32, i32) {
    %c0_i32 = arith.constant 0 : i32
    %c0_i32_0 = arith.constant 0 : i32
    %c0_i32_1 = arith.constant 0 : i32
    return %c0_i32, %c0_i32_0 : i32, i32
  }
  func.func @transform_5(%arg0: i32) -> (i32, i32) {
    %c0_i32 = arith.constant 0 : i32
    %c0_i32_0 = arith.constant 0 : i32
    %c0_i32_1 = arith.constant 0 : i32
    return %c0_i32, %c0_i32_0 : i32, i32
  }
  func.func @transform_6(%arg0: i32) -> (i32, i32) {
    %c0_i32 = arith.constant 0 : i32
    %c0_i32_0 = arith.constant 0 : i32
    %c0_i32_1 = arith.constant 0 : i32
    return %c0_i32, %c0_i32_0 : i32, i32
  }
  func.func @transform_7(%arg0: i32) -> (i32, i32) {
    %c0_i32 = arith.constant 0 : i32
    %c0_i32_0 = arith.constant 0 : i32
    %c0_i32_1 = arith.constant 0 : i32
    return %c0_i32, %c0_i32_0 : i32, i32
  }
  func.func @transform_8(%arg0: i32) -> (i32, i32) {
    %c0_i32 = arith.constant 0 : i32
    %c0_i32_0 = arith.constant 0 : i32
    %c0_i32_1 = arith.constant 0 : i32
    return %c0_i32, %c0_i32_0 : i32, i32
  }
  func.func @transform_9(%arg0: i32) -> (i32, i32) {
    %c0_i32 = arith.constant 0 : i32
    %c0_i32_0 = arith.constant 0 : i32
    return %c0_i32, %arg0 : i32, i32
  }
}

</mosaic_0001>

<bundles_post_ra>
// kernel: tpu_custom_call.1
= control target key start
LH: loop header
LB: loop body
LE: loop exit
PB: predicated region body
PF: predicated region fallthrough
CT: control target
= control target key end

     0   :  { %vm498_vm0 = vcmask 130048   ;;  %v4234_v3 = vmov 0   ;;  %vm1508_vm2 = vcmask 31744   ;;  %s6081_s0 = inlined_call_operand.vmem [shape: f32[128,16], index: 0, kind: input, shape index: {}]   ;;  %s6082_s1 = inlined_call_operand.vmem [shape: f32[128,4], index: 1, kind: input, shape index: {}]   ;;  %s6083_s2 = inlined_call_operand.vmem [shape: f32[512,16], index: 2, kind: input, shape index: {}]   ;;  %s6084_s3 = inlined_call_operand.vmem [shape: f32[512,1], index: 3, kind: input, shape index: {}]   ;;  %s6085_s4 = inlined_call_operand.vmem [shape: bf16[384,512], index: 4, kind: input, shape index: {}]   ;;  %s6086_s5 = inlined_call_operand.vmem [shape: bf16[384,4], index: 5, kind: input, shape index: {}]   ;;  %s6087_s6 = inlined_call_operand.vmem [shape: f32[384,1], index: 6, kind: input, shape index: {}]   ;;  %s6088_s7 = inlined_call_operand.vmem [shape: f32[8,384], index: 7, kind: input, shape index: {}]   ;;  %s6089_s8 = inlined_call_operand.vmem [shape: f32[8,1], index: 8, kind: input, shape index: {}]   ;;  %s6090_s9 = inlined_call_operand.hbm [shape: f32[8,128], index: 9, kind: output, shape index: {}]  }
   0x1   :  { %v146_v0 = vld [vmem:[%s6084_s3 + $0x100] sm:$0xff]  ;;  %4041 = vset.pattern.permute.xlu1 %v4234_v3  ;;  %4040 = vset.pattern.permute.xlu0 %v4234_v3  ;;  %v99_v4 = vld [vmem:[%s6081_s0 + $0x8] sm:$0xff]  ;;  %vm4305_vm1 = vmpackc.low %vm498_vm0, %vm498_vm0 }
   0x2   :  { %v114_v1 = vld [vmem:[%s6084_s3] sm:$0xff]  ;;  %340 = vperm.xlu1 %4041, %v146_v0   ;;  %v147_v7 = vld [vmem:[%s6084_s3 + $0x108] sm:$0xff]  ;;  %v100_v9 = vld [vmem:[%s6081_s0 + $0x10] sm:$0xff] }
   0x3   :  { %v98_v2 = vld [vmem:[%s6081_s0] sm:$0xff]  ;;  %180 = vperm.xlu0 %4040, %v114_v1   ;;  %v115_v8 = vld [vmem:[%s6084_s3 + $0x8] sm:$0xff]  ;;  %v101_v10 = vld [vmem:[%s6081_s0 + $0x18] sm:$0xff] }
   0x4   :  { %v3923_v6 = vpack.c.bf16 %v99_v4, %v98_v2  ;;  %v3929_v11 = vpack.c.bf16 %v101_v10, %v100_v9  ;;  %v117_v12 = vld [vmem:[%s6084_s3 + $0x18] sm:$0xff]  ;;  %v116_v13 = vld [vmem:[%s6084_s3 + $0x10] sm:$0xff]  ;;  %v102_v14 = vld [vmem:[%s6081_s0 + $0x20] sm:$0xff] }
   0x5   :  { %v103_v15 = vld [vmem:[%s6081_s0 + $0x28] sm:$0xff]  ;;  %v149_v16 = vld [vmem:[%s6084_s3 + $0x118] sm:$0xff]  ;;  %v148_v17 = vld [vmem:[%s6084_s3 + $0x110] sm:$0xff] }
   0x6   :  { %3925 = vmatprep.subr.msk.bf16.mxu0 %vm4305_vm1, %v3923_v6  ;;  %345 = vperm.xlu1 %4041, %v147_v7   ;;  %v3935_v18 = vpack.c.bf16 %v103_v15, %v102_v14  ;;  %v119_v19 = vld [vmem:[%s6084_s3 + $0x28] sm:$0xff]  ;;  %v118_v20 = vld [vmem:[%s6084_s3 + $0x20] sm:$0xff]  ;;  %v104_v21 = vld [vmem:[%s6081_s0 + $0x30] sm:$0xff] }
   0x7   :  { %3928 = vmatpush3.bf16.xpose.msk.msra.mxu0 %vm4305_vm1, %v3923_v6  ;;  %185 = vperm.xlu0 %4040, %v115_v8   ;;  %v105_v22 = vld [vmem:[%s6081_s0 + $0x38] sm:$0xff]  ;;  %v34_v23 = vld [vmem:[%s6083_s2] sm:$0xff]  ;;  %v151_v24 = vld [vmem:[%s6084_s3 + $0x128] sm:$0xff] }
   0x8   :  { %3931 = vmatprep.subr.msk.bf16.mxu0 %vm4305_vm1, %v3929_v11  ;;  %v150_v25 = vld [vmem:[%s6084_s3 + $0x120] sm:$0xff]  ;;  %v3941_v26 = vpack.c.bf16 %v105_v22, %v104_v21  ;;  %3728 = vmatprep.mubr.msk.f32.mxu0 %vm498_vm0, %v34_v23  ;;  %v121_v27 = vld [vmem:[%s6084_s3 + $0x38] sm:$0xff]  ;;  %v120_v28 = vld [vmem:[%s6084_s3 + $0x30] sm:$0xff] }
   0x9   :  { %v106_v29 = vld [vmem:[%s6081_s0 + $0x40] sm:$0xff]  ;;  %v107_v30 = vld [vmem:[%s6081_s0 + $0x48] sm:$0xff]  ;;  %v153_v31 = vld [vmem:[%s6084_s3 + $0x138] sm:$0xff] }
   0xa   :  { %195 = vperm.xlu1 %4041, %v117_v12   ;;  %v152_v32 = vld [vmem:[%s6084_s3 + $0x130] sm:$0xff]  ;;  %v3947_v33 = vpack.c.bf16 %v107_v30, %v106_v29  ;;  %v123_v34 = vld [vmem:[%s6084_s3 + $0x48] sm:$0xff]  ;;  %v122_v35 = vld [vmem:[%s6084_s3 + $0x40] sm:$0xff] }
   0xb   :  { %190 = vperm.xlu0 %4040, %v116_v13   ;;  %v108_v36 = vld [vmem:[%s6081_s0 + $0x50] sm:$0xff]  ;;  %v109_v37 = vld [vmem:[%s6081_s0 + $0x58] sm:$0xff]  ;;  %v155_v38 = vld [vmem:[%s6084_s3 + $0x148] sm:$0xff] }
   0xc   :  { %v154_v39 = vld [vmem:[%s6084_s3 + $0x140] sm:$0xff]  ;;  %v3953_v40 = vpack.c.bf16 %v109_v37, %v108_v36  ;;  %v125_v41 = vld [vmem:[%s6084_s3 + $0x58] sm:$0xff]  ;;  %v124_v42 = vld [vmem:[%s6084_s3 + $0x50] sm:$0xff] }
   0xd   :  { %v110_v43 = vld [vmem:[%s6081_s0 + $0x60] sm:$0xff]  ;;  %v111_v44 = vld [vmem:[%s6081_s0 + $0x68] sm:$0xff]  ;;  %v157_v45 = vld [vmem:[%s6084_s3 + $0x158] sm:$0xff] }
   0xe   :  { %355 = vperm.xlu1 %4041, %v149_v16   ;;  %v156_v46 = vld [vmem:[%s6084_s3 + $0x150] sm:$0xff]  ;;  %v3959_v47 = vpack.c.bf16 %v111_v44, %v110_v43  ;;  %v127_v48 = vld [vmem:[%s6084_s3 + $0x68] sm:$0xff]  ;;  %v126_v49 = vld [vmem:[%s6084_s3 + $0x60] sm:$0xff] }
   0xf   :  { %3934 = vmatpush3.bf16.xpose.msk.msra.mxu0 %vm4305_vm1, %v3929_v11  ;;  %350 = vperm.xlu0 %4040, %v148_v17   ;;  %v112_v50 = vld [vmem:[%s6081_s0 + $0x70] sm:$0xff]  ;;  %v113_v51 = vld [vmem:[%s6081_s0 + $0x78] sm:$0xff]  ;;  %v159_v52 = vld [vmem:[%s6084_s3 + $0x168] sm:$0xff] }
  0x10   :  { %3937 = vmatprep.subr.msk.bf16.mxu0 %vm4305_vm1, %v3935_v18  ;;  %v158_v53 = vld [vmem:[%s6084_s3 + $0x160] sm:$0xff]  ;;  %v3965_v54 = vpack.c.bf16 %v113_v51, %v112_v50  ;;  %v129_v55 = vld [vmem:[%s6084_s3 + $0x78] sm:$0xff]  ;;  %v128_v56 = vld [vmem:[%s6084_s3 + $0x70] sm:$0xff] }
  0x11   :  { %v161_v57 = vld [vmem:[%s6084_s3 + $0x178] sm:$0xff]  ;;  %v160_v58 = vld [vmem:[%s6084_s3 + $0x170] sm:$0xff]  ;;  %v1364_v59 = vld [vmem:[%s6082_s1] sm:$0xff] }
  0x12   :  { %205 = vperm.xlu1 %4041, %v119_v19   ;;  %v1365_v60 = vld [vmem:[%s6082_s1 + $0x8] sm:$0xff]  ;;  %v130_v63 = vld [vmem:[%s6084_s3 + $0x80] sm:$0xff]  ;;  %v36_v5 = vld [vmem:[%s6083_s2 + $0x10] sm:$0xff] }
  0x13   :  { %200 = vperm.xlu0 %4040, %v118_v20   ;;  %v1380_v61 = vpack.c.bf16 %v1365_v60, %v1364_v59  ;;  %v131_v62 = vld [vmem:[%s6084_s3 + $0x88] sm:$0xff]  ;;  %v162_v4 = vld [vmem:[%s6084_s3 + $0x180] sm:$0xff]  ;;  %v1366_v6 = vld [vmem:[%s6082_s1 + $0x10] sm:$0xff] }
  0x14   :  { %v35_v1 = vld [vmem:[%s6083_s2 + $0x8] sm:$0xff]  ;;  %v1367_v7 = vld [vmem:[%s6082_s1 + $0x18] sm:$0xff]  ;;  %v132_v11 = vld [vmem:[%s6084_s3 + $0x90] sm:$0xff] }
  0x15   :  { %v1582_v0 = vsel %vm1508_vm2, %v1380_v61, 0  ;;  %4027 = vmatprep.subr.msk.bf16.mxu1 %vm1508_vm2, %v1380_v61  ;;  %v163_v2 = vld [vmem:[%s6084_s3 + $0x188] sm:$0xff]  ;;  %v37_v8 = vld [vmem:[%s6083_s2 + $0x18] sm:$0xff]  ;;  %v1381_v9 = vpack.c.bf16 %v1367_v7, %v1366_v6  ;;  %v38_v13 = vld [vmem:[%s6083_s2 + $0x20] sm:$0xff] }
  0x16   :  { %365 = vperm.xlu1 %4041, %v151_v24   ;;  %3825 = vmatpush3.bf16.xpose.msra.mxu1 %v1582_v0  ;;  %v133_v10 = vld [vmem:[%s6084_s3 + $0x98] sm:$0xff]  ;;  %v39_v14 = vld [vmem:[%s6083_s2 + $0x28] sm:$0xff]  ;;  %v164_v16 = vld [vmem:[%s6084_s3 + $0x190] sm:$0xff] }
  0x17   :  { %3940 = vmatpush3.bf16.xpose.msk.msra.mxu0 %vm4305_vm1, %v3935_v18  ;;  %360 = vperm.xlu0 %4040, %v150_v25   ;;  %v1585_v12 = vsel %vm1508_vm2, %v1381_v9, 0  ;;  %v165_v15 = vld [vmem:[%s6084_s3 + $0x198] sm:$0xff]  ;;  %v40_v17 = vld [vmem:[%s6083_s2 + $0x30] sm:$0xff]  ;;  %v1368_v18 = vld [vmem:[%s6082_s1 + $0x20] sm:$0xff] }
  0x18   :  { %3943 = vmatprep.subr.msk.bf16.mxu0 %vm4305_vm1, %v3941_v26  ;;  %4028 = vmatprep.subr.msk.bf16.mxu1 %vm1508_vm2, %v1381_v9  ;;  %v1369_v19 = vld [vmem:[%s6082_s1 + $0x28] sm:$0xff]  ;;  %v41_v20 = vld [vmem:[%s6083_s2 + $0x38] sm:$0xff]  ;;  %v134_v23 = vld [vmem:[%s6084_s3 + $0xa0] sm:$0xff] }
  0x19   :  { %v1382_v21 = vpack.c.bf16 %v1369_v19, %v1368_v18  ;;  %v135_v22 = vld [vmem:[%s6084_s3 + $0xa8] sm:$0xff]  ;;  %v42_v25 = vld [vmem:[%s6083_s2 + $0x40] sm:$0xff]  ;;  %v44_v29 = vld [vmem:[%s6083_s2 + $0x50] sm:$0xff] }
  0x1a   :  { %215 = vperm.xlu1 %4041, %v121_v27   ;;  %v167_v27 = vld [vmem:[%s6084_s3 + $0x1a8] sm:$0xff]  ;;  %v1370_v30 = vld [vmem:[%s6082_s1 + $0x30] sm:$0xff]  ;;  %v46_v37 = vld [vmem:[%s6083_s2 + $0x60] sm:$0xff] }
  0x1b   :  { %210 = vperm.xlu0 %4040, %v120_v28   ;;  %v1588_v24 = vsel %vm1508_vm2, %v1382_v21, 0  ;;  %v166_v28 = vld [vmem:[%s6084_s3 + $0x1a0] sm:$0xff]  ;;  %v1373_v43 = vld [vmem:[%s6082_s1 + $0x48] sm:$0xff]  ;;  %v49_v44 = vld [vmem:[%s6083_s2 + $0x78] sm:$0xff] }
  0x1c   :  { %v51_v50 = vld [vmem:[%s6083_s2 + $0x88] sm:$0xff]  ;;  %v141_v59 = vld [vmem:[%s6084_s3 + $0xd8] sm:$0xff]  ;;  %v140_v60 = vld [vmem:[%s6084_s3 + $0xd0] sm:$0xff] }
  0x1d   :  { %v171_v51 = vld [vmem:[%s6084_s3 + $0x1c8] sm:$0xff]  ;;  %v173_v0 = vld [vmem:[%s6084_s3 + $0x1d8] sm:$0xff]  ;;  %v58_v7 = vld [vmem:[%s6083_s2 + $0xc0] sm:$0xff] }
  0x1e   :  { %375 = vperm.xlu1 %4041, %v153_v31   ;;  %3827 = vmatpush3.bf16.xpose.msra.mxu1 %v1585_v12  ;;  %v1371_v31 = vld [vmem:[%s6082_s1 + $0x38] sm:$0xff]  ;;  %v142_v9 = vld [vmem:[%s6084_s3 + $0xe0] sm:$0xff]  ;;  %v60_v12 = vld [vmem:[%s6083_s2 + $0xd0] sm:$0xff] }
  0x1f   :  { %3946 = vmatpush3.bf16.xpose.msk.msra.mxu0 %vm4305_vm1, %v3941_v26  ;;  %370 = vperm.xlu0 %4040, %v152_v32   ;;  %v43_v26 = vld [vmem:[%s6083_s2 + $0x48] sm:$0xff]  ;;  %v45_v32 = vld [vmem:[%s6083_s2 + $0x58] sm:$0xff] }
  0x20   :  { %3949 = vmatprep.subr.msk.bf16.mxu0 %vm4305_vm1, %v3947_v33  ;;  %4029 = vmatprep.subr.msk.bf16.mxu1 %vm1508_vm2, %v1382_v21  ;;  %v57_v6 = vld [vmem:[%s6083_s2 + $0xb8] sm:$0xff] }
  0x21   :  { %v61_v18 = vld [vmem:[%s6083_s2 + $0xd8] sm:$0xff] }
  0x22   :  { %225 = vperm.xlu1 %4041, %v123_v34   ;;  %v137_v34 = vld [vmem:[%s6084_s3 + $0xb8] sm:$0xff] }
  0x23   :  { %220 = vperm.xlu0 %4040, %v122_v35   ;;  %v136_v35 = vld [vmem:[%s6084_s3 + $0xb0] sm:$0xff] }
  0x26   :  { %385 = vperm.xlu1 %4041, %v155_v38   ;;  %3829 = vmatpush3.bf16.xpose.msra.mxu1 %v1588_v24  ;;  %v47_v38 = vld [vmem:[%s6083_s2 + $0x68] sm:$0xff] }
  0x27   :  { %3952 = vmatpush3.bf16.xpose.msk.msra.mxu0 %vm4305_vm1, %v3947_v33  ;;  %380 = vperm.xlu0 %4040, %v154_v39   ;;  %v1383_v33 = vpack.c.bf16 %v1371_v31, %v1370_v30  ;;  %v169_v39 = vld [vmem:[%s6084_s3 + $0x1b8] sm:$0xff] }
  0x28   :  { %3955 = vmatprep.subr.msk.bf16.mxu0 %vm4305_vm1, %v3953_v40 }
  0x29   :  { %4030 = vmatprep.subr.msk.bf16.mxu1 %vm1508_vm2, %v1383_v33  ;;  %v1591_v36 = vsel %vm1508_vm2, %v1383_v33, 0 }
  0x2a   :  { %235 = vperm.xlu1 %4041, %v125_v41   ;;  %v48_v41 = vld [vmem:[%s6083_s2 + $0x70] sm:$0xff] }
  0x2b   :  { %230 = vperm.xlu0 %4040, %v124_v42   ;;  %v1372_v42 = vld [vmem:[%s6082_s1 + $0x40] sm:$0xff] }
  0x2e   :  { %395 = vperm.xlu1 %4041, %v157_v45   ;;  %3831 = vmatpush3.bf16.xpose.msra.mxu1 %v1591_v36  ;;  %v1384_v45 = vpack.c.bf16 %v1373_v43, %v1372_v42 }
  0x2f   :  { %3958 = vmatpush3.bf16.xpose.msk.msra.mxu0 %vm4305_vm1, %v3953_v40  ;;  %390 = vperm.xlu0 %4040, %v156_v46   ;;  %v168_v40 = vld [vmem:[%s6084_s3 + $0x1b0] sm:$0xff]  ;;  %v139_v46 = vld [vmem:[%s6084_s3 + $0xc8] sm:$0xff] }
  0x30   :  { %3961 = vmatprep.subr.msk.bf16.mxu0 %vm4305_vm1, %v3959_v47  ;;  %4031 = vmatprep.subr.msk.bf16.mxu1 %vm1508_vm2, %v1384_v45 }
  0x32   :  { %245 = vperm.xlu1 %4041, %v127_v48   ;;  %v1594_v48 = vsel %vm1508_vm2, %v1384_v45, 0 }
  0x33   :  { %240 = vperm.xlu0 %4040, %v126_v49   ;;  %v50_v49 = vld [vmem:[%s6083_s2 + $0x80] sm:$0xff] }
  0x36   :  { %405 = vperm.xlu1 %4041, %v159_v52   ;;  %3833 = vmatpush3.bf16.xpose.msra.mxu1 %v1594_v48  ;;  %v170_v52 = vld [vmem:[%s6084_s3 + $0x1c0] sm:$0xff] }
  0x37   :  { %3964 = vmatpush3.bf16.xpose.msk.msra.mxu0 %vm4305_vm1, %v3959_v47  ;;  %400 = vperm.xlu0 %4040, %v158_v53   ;;  %v138_v47 = vld [vmem:[%s6084_s3 + $0xc0] sm:$0xff]  ;;  %v52_v53 = vld [vmem:[%s6083_s2 + $0x90] sm:$0xff] }
  0x38   :  { %3967 = vmatprep.subr.msk.bf16.mxu0 %vm4305_vm1, %v3965_v54 }
  0x3a   :  { %255 = vperm.xlu1 %4041, %v129_v55   ;;  %v1375_v55 = vld [vmem:[%s6082_s1 + $0x58] sm:$0xff] }
  0x3b   :  { %250 = vperm.xlu0 %4040, %v128_v56   ;;  %v53_v56 = vld [vmem:[%s6083_s2 + $0x98] sm:$0xff] }
  0x3e   :  { %415 = vperm.xlu1 %4041, %v161_v57  }
  0x3f   :  { %3970 = vmatpush3.bf16.xpose.msk.msra.mxu0 %vm4305_vm1, %v3965_v54  ;;  %410 = vperm.xlu0 %4040, %v160_v58   ;;  %v1374_v54 = vld [vmem:[%s6082_s1 + $0x50] sm:$0xff]  ;;  %v54_v58 = vld [vmem:[%s6083_s2 + $0xa0] sm:$0xff] }
  0x40   :  { %2535 = vmatprep.subr.bf16.mxu0 %v4234_v3  ;;  %v1385_v57 = vpack.c.bf16 %v1375_v55, %v1374_v54 }
  0x42   :  { %265 = vperm.xlu1 %4041, %v131_v62   ;;  %4032 = vmatprep.subr.msk.bf16.mxu1 %vm1508_vm2, %v1385_v57  ;;  %v1597_v61 = vsel %vm1508_vm2, %v1385_v57, 0  ;;  %v55_v62 = vld [vmem:[%s6083_s2 + $0xa8] sm:$0xff] }
  0x43   :  { %260 = vperm.xlu0 %4040, %v130_v63   ;;  %v56_v63 = vld [vmem:[%s6083_s2 + $0xb0] sm:$0xff]  ;;  %3835 = vmatpush3.bf16.xpose.msra.mxu1 %v1597_v61 }
  0x46   :  { %3729 = vmatmul.mubr.msk.f32.vlgmr.msra.gmra.mrb[0].mxu0 %vm498_vm0, %v35_v1  ;;  %425 = vperm.xlu1 %4041, %v163_v2   ;;  %v172_v1 = vld [vmem:[%s6084_s3 + $0x1d0] sm:$0xff]  ;;  %v1376_v2 = vld [vmem:[%s6082_s1 + $0x60] sm:$0xff] }
  0x47   :  { %3731 = vmatprep.mubr.msk.f32.mxu0 %vm498_vm0, %v36_v5  ;;  %420 = vperm.xlu0 %4040, %v162_v4   ;;  %v1377_v4 = vld [vmem:[%s6082_s1 + $0x68] sm:$0xff] }
  0x48   :  { %v1386_v5 = vpack.c.bf16 %v1377_v4, %v1376_v2 }
  0x4a   :  { %3732 = vmatmul.mubr.msk.f32.gmra.mrb[2].mxu0 %vm498_vm0, %v37_v8  ;;  %275 = vperm.xlu1 %4041, %v133_v10   ;;  %v143_v8 = vld [vmem:[%s6084_s3 + $0xe8] sm:$0xff]  ;;  %v1600_v10 = vsel %vm1508_vm2, %v1386_v5, 0 }
  0x4b   :  { %3734 = vmatprep.mubr.msk.f32.mxu0 %vm498_vm0, %v38_v13  ;;  %270 = vperm.xlu0 %4040, %v132_v11   ;;  %v59_v11 = vld [vmem:[%s6083_s2 + $0xc8] sm:$0xff] }
  0x4c   :  { %4033 = vmatprep.subr.msk.bf16.mxu1 %vm1508_vm2, %v1386_v5  ;;  %v175_v13 = vld [vmem:[%s6084_s3 + $0x1e8] sm:$0xff] }
  0x4d   :  { %3837 = vmatpush3.bf16.xpose.msra.mxu1 %v1600_v10 }
  0x4e   :  { %3735 = vmatmul.mubr.msk.f32.gmra.mrb[4].mxu0 %vm498_vm0, %v39_v14  ;;  %435 = vperm.xlu1 %4041, %v165_v15   ;;  %v174_v14 = vld [vmem:[%s6084_s3 + $0x1e0] sm:$0xff]  ;;  %v1378_v15 = vld [vmem:[%s6082_s1 + $0x70] sm:$0xff] }
  0x4f   :  { %3737 = vmatprep.mubr.msk.f32.mxu0 %vm498_vm0, %v40_v17  ;;  %430 = vperm.xlu0 %4040, %v164_v16   ;;  %v1379_v16 = vld [vmem:[%s6082_s1 + $0x78] sm:$0xff] }
  0x50   :  { %v1387_v17 = vpack.c.bf16 %v1379_v16, %v1378_v15 }
  0x52   :  { %3738 = vmatmul.mubr.msk.f32.gmra.mrb[6].mxu0 %vm498_vm0, %v41_v20  ;;  %285 = vperm.xlu1 %4041, %v135_v22   ;;  %v1603_v19 = vsel %vm1508_vm2, %v1387_v17, 0  ;;  %v62_v20 = vld [vmem:[%s6083_s2 + $0xe0] sm:$0xff] }
  0x53   :  { %3740 = vmatprep.mubr.msk.f32.mxu0 %vm498_vm0, %v42_v25  ;;  %280 = vperm.xlu0 %4040, %v134_v23  }
  0x54   :  { %4034 = vmatprep.subr.msk.bf16.mxu1 %vm1508_vm2, %v1387_v17 }
  0x56   :  { %3741 = vmatmul.mubr.msk.f32.gmra.mrb[8].mxu0 %vm498_vm0, %v43_v26  ;;  %445 = vperm.xlu1 %4041, %v167_v27  }
  0x57   :  { %3743 = vmatprep.mubr.msk.f32.mxu0 %vm498_vm0, %v44_v29  ;;  %440 = vperm.xlu0 %4040, %v166_v28  }
  0x5a   :  { %3744 = vmatmul.mubr.msk.f32.gmra.mrb[10].mxu0 %vm498_vm0, %v45_v32  ;;  %295 = vperm.xlu1 %4041, %v137_v34  }
  0x5b   :  { %3746 = vmatprep.mubr.msk.f32.mxu0 %vm498_vm0, %v46_v37  ;;  %290 = vperm.xlu0 %4040, %v136_v35  }
  0x5e   :  { %3747 = vmatmul.mubr.msk.f32.gmra.mrb[12].mxu0 %vm498_vm0, %v47_v38  ;;  %455 = vperm.xlu1 %4041, %v169_v39  }
  0x5f   :  { %3749 = vmatprep.mubr.msk.f32.mxu0 %vm498_vm0, %v48_v41  ;;  %450 = vperm.xlu0 %4040, %v168_v40  }
  0x62   :  { %3750 = vmatmul.mubr.msk.f32.gmra.mrb[14].mxu0 %vm498_vm0, %v49_v44  ;;  %305 = vperm.xlu1 %4041, %v139_v46  }
  0x63   :  { %3752 = vmatprep.mubr.msk.f32.mxu0 %vm498_vm0, %v50_v49  ;;  %300 = vperm.xlu0 %4040, %v138_v47  }
  0x66   :  { %3753 = vmatmul.mubr.msk.f32.gmra.mrb[16].mxu0 %vm498_vm0, %v51_v50  ;;  %465 = vperm.xlu1 %4041, %v171_v51  }
  0x67   :  { %3755 = vmatprep.mubr.msk.f32.mxu0 %vm498_vm0, %v52_v53  ;;  %460 = vperm.xlu0 %4040, %v170_v52  }
  0x6a   :  { %3756 = vmatmul.mubr.msk.f32.gmra.mrb[18].mxu0 %vm498_vm0, %v53_v56  ;;  %315 = vperm.xlu1 %4041, %v141_v59  }
  0x6b   :  { %3758 = vmatprep.mubr.msk.f32.mxu0 %vm498_vm0, %v54_v58  ;;  %310 = vperm.xlu0 %4040, %v140_v60  }
  0x6e   :  { %3759 = vmatmul.mubr.msk.f32.gmra.mrb[20].mxu0 %vm498_vm0, %v55_v62  ;;  %475 = vperm.xlu1 %4041, %v173_v0  }
  0x6f   :  { %3761 = vmatprep.mubr.msk.f32.mxu0 %vm498_vm0, %v56_v63  ;;  %470 = vperm.xlu0 %4040, %v172_v1  }
  0x72   :  { %3762 = vmatmul.mubr.msk.f32.gmra.mrb[22].mxu0 %vm498_vm0, %v57_v6  ;;  %325 = vperm.xlu1 %4041, %v143_v8  }
  0x73   :  { %3764 = vmatprep.mubr.msk.f32.mxu0 %vm498_vm0, %v58_v7  ;;  %320 = vperm.xlu0 %4040, %v142_v9  }
  0x76   :  { %3765 = vmatmul.mubr.msk.f32.gmra.mrb[24].mxu0 %vm498_vm0, %v59_v11  ;;  %485 = vperm.xlu1 %4041, %v175_v13  }
  0x77   :  { %3767 = vmatprep.mubr.msk.f32.mxu0 %vm498_vm0, %v60_v12  ;;  %480 = vperm.xlu0 %4040, %v174_v14  }
  0x78   :  { %14 = vsyncpa [#allocation3], 0  ;;  %v145_v21 = vld [vmem:[%s6084_s3 + $0xf8] sm:$0xff]  ;;  %v144_v22 = vld [vmem:[%s6084_s3 + $0xf0] sm:$0xff]  ;;  %3839 = vmatpush3.bf16.xpose.msra.mxu1 %v1603_v19  ;;  %vm4236_vm3 = vmmov 0   ;;  %s4238_s17 = smov [#allocation2]  }
  0x79   :  { %v63_v23 = vld [vmem:[%s6083_s2 + $0xe8] sm:$0xff]  ;;  %v4042_v24 = vld [vmem:[%s6086_s5] sm:$0xff]   ;;  %2310 = vmatprep.subr.bf16.mxu1 %v4234_v3  ;;  %v64_v25 = vld [vmem:[%s6083_s2 + $0xf0] sm:$0xff] }
  0x7a   :  { %3768 = vmatmul.mubr.msk.f32.gmra.mrb[26].mxu0 %vm498_vm0, %v61_v18  ;;  %335 = vperm.xlu1 %4041, %v145_v21   ;;  %v177_v26 = vld [vmem:[%s6084_s3 + $0x1f8] sm:$0xff]  ;;  %v176_v27 = vld [vmem:[%s6084_s3 + $0x1f0] sm:$0xff]  ;;  %v4043_v28 = vld [vmem:[%s6086_s5 + $0x8] sm:$0xff]  }
  0x7b   :  { %3770 = vmatprep.mubr.msk.f32.mxu0 %vm498_vm0, %v62_v20  ;;  %330 = vperm.xlu0 %4040, %v144_v22   ;;  %v65_v29 = vld [vmem:[%s6083_s2 + $0xf8] sm:$0xff]  ;;  %v66_v30 = vld [vmem:[%s6083_s2 + $0x100] sm:$0xff]  ;;  %v2777_v31 = vld [vmem:[%s6087_s6 + $0x88] sm:$0xff] }
  0x7c   :  { %3840 = vmatprep.mubr.msk.bf16.mxu1 %vm1508_vm2, %v4042_v24  ;;  %v2776_v32 = vld [vmem:[%s6087_s6 + $0x80] sm:$0xff]  ;;  %v67_v33 = vld [vmem:[%s6083_s2 + $0x108] sm:$0xff]  ;;  %v4044_v34 = vld [vmem:[%s6086_s5 + $0x10] sm:$0xff]  }
  0x7d   :  { %v68_v35 = vld [vmem:[%s6083_s2 + $0x110] sm:$0xff]  ;;  %v2761_v36 = vld [vmem:[%s6087_s6 + $0x8] sm:$0xff]  ;;  %v2760_v37 = vld [vmem:[%s6087_s6] sm:$0xff] }
  0x7e   :  { %3771 = vmatmul.mubr.msk.f32.gmra.mrb[28].mxu0 %vm498_vm0, %v63_v23  ;;  %495 = vperm.xlu1 %4041, %v177_v26   ;;  %v4045_v38 = vld [vmem:[%s6086_s5 + $0x18] sm:$0xff]   ;;  %v70_v40 = vld [vmem:[%s6083_s2 + $0x120] sm:$0xff]  ;;  %v2778_v42 = vld [vmem:[%s6087_s6 + $0x90] sm:$0xff] }
  0x7f   :  { %3773 = vmatprep.mubr.msk.f32.mxu0 %vm498_vm0, %v64_v25  ;;  %490 = vperm.xlu0 %4040, %v176_v27   ;;  %v69_v39 = vld [vmem:[%s6083_s2 + $0x118] sm:$0xff]  ;;  %v71_v43 = vld [vmem:[%s6083_s2 + $0x128] sm:$0xff]  ;;  %v4046_v44 = vld [vmem:[%s6086_s5 + $0x20] sm:$0xff]  }
  0x80   :  { %3841 = vmatmul.mubr.msk.bf16.vlgmr.msra.gmra.mrb[0].mxu1 %vm1508_vm2, %v4043_v28  ;;  %v2779_v41 = vld [vmem:[%s6087_s6 + $0x98] sm:$0xff]  ;;  %v72_v45 = vld [vmem:[%s6083_s2 + $0x130] sm:$0xff]  ;;  %v4047_v48 = vld [vmem:[%s6086_s5 + $0x28] sm:$0xff]  }
  0x81   :  { %3844 = vmatprep.mubr.msk.bf16.mxu1 %vm1508_vm2, %v4044_v34  ;;  %v2763_v46 = vld [vmem:[%s6087_s6 + $0x18] sm:$0xff]  ;;  %v2762_v47 = vld [vmem:[%s6087_s6 + $0x10] sm:$0xff]  ;;  %v74_v50 = vld [vmem:[%s6083_s2 + $0x140] sm:$0xff]  ;;  %v4916_v8 = vpop.permute.xlu1 %340 }
  0x82   :  { %3774 = vmatmul.mubr.msk.f32.gmra.mrb[30].mxu0 %vm498_vm0, %v65_v29  ;;  %2895 = vperm.xlu1 %4041, %v2777_v31   ;;  %v73_v49 = vld [vmem:[%s6083_s2 + $0x138] sm:$0xff]  ;;  %v2793_v51 = vld [vmem:[%s6087_s6 + $0x108] sm:$0xff]  ;;  %v2792_v52 = vld [vmem:[%s6087_s6 + $0x100] sm:$0xff]  ;;  %v4925_v11 = vpop.permute.xlu0 %180 }
  0x83   :  { %3776 = vmatprep.mubr.msk.f32.mxu0 %vm498_vm0, %v66_v30  ;;  %2890 = vperm.xlu0 %4040, %v2776_v32   ;;  %v75_v53 = vld [vmem:[%s6083_s2 + $0x148] sm:$0xff]  ;;  %v4048_v54 = vld [vmem:[%s6086_s5 + $0x30] sm:$0xff]   ;;  %v2780_v57 = vld [vmem:[%s6087_s6 + $0xa0] sm:$0xff] }
  0x84   :  { %v76_v55 = vld [vmem:[%s6083_s2 + $0x150] sm:$0xff]  ;;  %v2781_v56 = vld [vmem:[%s6087_s6 + $0xa8] sm:$0xff]  ;;  %v4049_v58 = vld [vmem:[%s6086_s5 + $0x38] sm:$0xff]  }
  0x85   :  { %v77_v59 = vld [vmem:[%s6083_s2 + $0x158] sm:$0xff]  ;;  %v78_v60 = vld [vmem:[%s6083_s2 + $0x160] sm:$0xff]  ;;  %v2765_v61 = vld [vmem:[%s6087_s6 + $0x28] sm:$0xff]  ;;  %v4948_v18 = vpop.permute.xlu1 %345 }
  0x86   :  { %3777 = vmatmul.mubr.msk.f32.gmra.mrb[32].mxu0 %vm498_vm0, %v67_v33  ;;  %2815 = vperm.xlu1 %4041, %v2761_v36   ;;  %v2764_v62 = vld [vmem:[%s6087_s6 + $0x20] sm:$0xff]  ;;  %v79_v63 = vld [vmem:[%s6083_s2 + $0x168] sm:$0xff]  ;;  %v80_v0 = vld [vmem:[%s6083_s2 + $0x170] sm:$0xff]  ;;  %v4955_v20 = vpop.permute.xlu0 %185 }
  0x87   :  { %3779 = vmatprep.mubr.msk.f32.mxu0 %vm498_vm0, %v68_v35  ;;  %2810 = vperm.xlu0 %4040, %v2760_v37   ;;  %v2795_v1 = vld [vmem:[%s6087_s6 + $0x118] sm:$0xff]  ;;  %v2794_v2 = vld [vmem:[%s6087_s6 + $0x110] sm:$0xff]  ;;  %v4050_v4 = vld [vmem:[%s6086_s5 + $0x40] sm:$0xff]  }
  0x88   :  { %3845 = vmatmul.mubr.msk.bf16.gmra.mrb[4].mxu1 %vm1508_vm2, %v4045_v38  ;;  %v4051_v5 = vld [vmem:[%s6086_s5 + $0x48] sm:$0xff]   ;;  %v81_v6 = vld [vmem:[%s6083_s2 + $0x178] sm:$0xff]  ;;  %v82_v7 = vld [vmem:[%s6083_s2 + $0x180] sm:$0xff] }
  0x89   :  { %3848 = vmatprep.mubr.msk.bf16.mxu1 %vm1508_vm2, %v4046_v44  ;;  %v2783_v9 = vld [vmem:[%s6087_s6 + $0xb8] sm:$0xff]  ;;  %v2782_v10 = vld [vmem:[%s6087_s6 + $0xb0] sm:$0xff]  ;;  %v83_v12 = vld [vmem:[%s6083_s2 + $0x188] sm:$0xff]  ;;  %v4975_v26 = vpop.permute.xlu1 %195 }
  0x8a   :  { %3780 = vmatmul.mubr.msk.f32.gmra.mrb[34].mxu0 %vm498_vm0, %v69_v39  ;;  %2905 = vperm.xlu1 %4041, %v2779_v41   ;;  %v84_v13 = vld [vmem:[%s6083_s2 + $0x190] sm:$0xff]  ;;  %v2767_v14 = vld [vmem:[%s6087_s6 + $0x38] sm:$0xff]  ;;  %v86_v21 = vld [vmem:[%s6083_s2 + $0x1a0] sm:$0xff]  ;;  %v4986_v30 = vpop.permute.xlu0 %190 }
  0x8b   :  { %3782 = vmatprep.mubr.msk.f32.mxu0 %vm498_vm0, %v70_v40  ;;  %2900 = vperm.xlu0 %4040, %v2778_v42   ;;  %v2766_v15 = vld [vmem:[%s6087_s6 + $0x30] sm:$0xff]  ;;  %v4053_v17 = vld [vmem:[%s6086_s5 + $0x58] sm:$0xff]   ;;  %v2797_v22 = vld [vmem:[%s6087_s6 + $0x128] sm:$0xff] }
  0x8c   :  { %v4052_v16 = vld [vmem:[%s6086_s5 + $0x50] sm:$0xff]   ;;  %v85_v19 = vld [vmem:[%s6083_s2 + $0x198] sm:$0xff]  ;;  %v2796_v23 = vld [vmem:[%s6087_s6 + $0x120] sm:$0xff] }
  0x8d   :  { %v87_v24 = vld [vmem:[%s6083_s2 + $0x1a8] sm:$0xff]  ;;  %v88_v25 = vld [vmem:[%s6083_s2 + $0x1b0] sm:$0xff]  ;;  %v2784_v28 = vld [vmem:[%s6087_s6 + $0xc0] sm:$0xff]  ;;  %v5008_v36 = vpop.permute.xlu1 %355 }
  0x8e   :  { %3783 = vmatmul.mubr.msk.f32.gmra.mrb[36].mxu0 %vm498_vm0, %v71_v43  ;;  %2825 = vperm.xlu1 %4041, %v2763_v46   ;;  %v2785_v27 = vld [vmem:[%s6087_s6 + $0xc8] sm:$0xff]  ;;  %v4054_v29 = vld [vmem:[%s6086_s5 + $0x60] sm:$0xff]   ;;  %v89_v32 = vld [vmem:[%s6083_s2 + $0x1b8] sm:$0xff]  ;;  %v5014_v38 = vpop.permute.xlu0 %350 }
  0x8f   :  { %3785 = vmatprep.mubr.msk.f32.mxu0 %vm498_vm0, %v72_v45  ;;  %2820 = vperm.xlu0 %4040, %v2762_v47   ;;  %v4055_v31 = vld [vmem:[%s6086_s5 + $0x68] sm:$0xff]   ;;  %v90_v33 = vld [vmem:[%s6083_s2 + $0x1c0] sm:$0xff]  ;;  %v92_v39 = vld [vmem:[%s6083_s2 + $0x1d0] sm:$0xff] }
  0x90   :  { %3849 = vmatmul.mubr.msk.bf16.gmra.mrb[8].mxu1 %vm1508_vm2, %v4047_v48  ;;  %v2769_v34 = vld [vmem:[%s6087_s6 + $0x48] sm:$0xff]  ;;  %v2768_v35 = vld [vmem:[%s6087_s6 + $0x40] sm:$0xff]  ;;  %v2799_v40 = vld [vmem:[%s6087_s6 + $0x138] sm:$0xff] }
  0x91   :  { %3852 = vmatprep.mubr.msk.bf16.mxu1 %vm1508_vm2, %v4048_v54  ;;  %v91_v37 = vld [vmem:[%s6083_s2 + $0x1c8] sm:$0xff]  ;;  %v2798_v41 = vld [vmem:[%s6087_s6 + $0x130] sm:$0xff]  ;;  %v4057_v43 = vld [vmem:[%s6086_s5 + $0x78] sm:$0xff]   ;;  %v5040_v46 = vpop.permute.xlu1 %205 }
  0x92   :  { %3786 = vmatmul.mubr.msk.f32.gmra.mrb[38].mxu0 %vm498_vm0, %v73_v49  ;;  %2975 = vperm.xlu1 %4041, %v2793_v51   ;;  %v4056_v42 = vld [vmem:[%s6086_s5 + $0x70] sm:$0xff]   ;;  %v93_v44 = vld [vmem:[%s6083_s2 + $0x1d8] sm:$0xff]  ;;  %v94_v45 = vld [vmem:[%s6083_s2 + $0x1e0] sm:$0xff]  ;;  %v5049_v49 = vpop.permute.xlu0 %200 }
  0x93   :  { %3788 = vmatprep.mubr.msk.f32.mxu0 %vm498_vm0, %v74_v50  ;;  %2970 = vperm.xlu0 %4040, %v2792_v52   ;;  %v2787_v47 = vld [vmem:[%s6087_s6 + $0xd8] sm:$0xff]  ;;  %v2786_v48 = vld [vmem:[%s6087_s6 + $0xd0] sm:$0xff]  ;;  %v95_v50 = vld [vmem:[%s6083_s2 + $0x1e8] sm:$0xff] }
  0x94   :  { %v96_v51 = vld [vmem:[%s6083_s2 + $0x1f0] sm:$0xff]  ;;  %v2771_v52 = vld [vmem:[%s6087_s6 + $0x58] sm:$0xff]  ;;  %v4058_v54 = vld [vmem:[%s6086_s5 + $0x80] sm:$0xff]  }
  0x96   :  { %3789 = vmatmul.mubr.msk.f32.gmra.mrb[40].mxu0 %vm498_vm0, %v75_v53  ;;  %2915 = vperm.xlu1 %4041, %v2781_v56   ;;  %v2770_v53 = vld [vmem:[%s6087_s6 + $0x50] sm:$0xff]  ;;  %v5072_v56 = vpop.permute.xlu1 %365 }
  0x97   :  { %3791 = vmatprep.mubr.msk.f32.mxu0 %vm498_vm0, %v76_v55  ;;  %2910 = vperm.xlu0 %4040, %v2780_v57   ;;  %v4059_v55 = vld [vmem:[%s6086_s5 + $0x88] sm:$0xff]   ;;  %v97_v57 = vld [vmem:[%s6083_s2 + $0x1f8] sm:$0xff] }
  0x98   :  { %3853 = vmatmul.mubr.msk.bf16.gmra.mrb[12].mxu1 %vm1508_vm2, %v4049_v58  ;;  %v5079_v58 = vpop.permute.xlu0 %360 }
  0x99   :  { %3856 = vmatprep.mubr.msk.bf16.mxu1 %vm1508_vm2, %v4050_v4  ;;  %v2773_v4 = vld [vmem:[%s6087_s6 + $0x68] sm:$0xff] }
  0x9a   :  { %3792 = vmatmul.mubr.msk.f32.gmra.mrb[42].mxu0 %vm498_vm0, %v77_v59  ;;  %2835 = vperm.xlu1 %4041, %v2765_v61   ;;  %v2801_v59 = vld [vmem:[%s6087_s6 + $0x148] sm:$0xff]  ;;  %v5089_v61 = vpop.permute.xlu1 %215 }
  0x9b   :  { %3794 = vmatprep.mubr.msk.f32.mxu0 %vm498_vm0, %v78_v60  ;;  %2830 = vperm.xlu0 %4040, %v2764_v62   ;;  %v2800_v60 = vld [vmem:[%s6087_s6 + $0x140] sm:$0xff]  ;;  %v2789_v62 = vld [vmem:[%s6087_s6 + $0xe8] sm:$0xff] }
  0x9e   :  { %3795 = vmatmul.mubr.msk.f32.gmra.mrb[44].mxu0 %vm498_vm0, %v79_v63  ;;  %2985 = vperm.xlu1 %4041, %v2795_v1   ;;  %v2788_v63 = vld [vmem:[%s6087_s6 + $0xe0] sm:$0xff]  ;;  %v5100_v1 = vpop.permute.xlu0 %210 }
  0x9f   :  { %3797 = vmatprep.mubr.msk.f32.mxu0 %vm498_vm0, %v80_v0  ;;  %2980 = vperm.xlu0 %4040, %v2794_v2   ;;  %v4060_v0 = vld [vmem:[%s6086_s5 + $0x90] sm:$0xff]   ;;  %v4061_v2 = vld [vmem:[%s6086_s5 + $0x98] sm:$0xff]  }
  0xa0   :  { %3857 = vmatmul.mubr.msk.bf16.gmra.mrb[16].mxu1 %vm1508_vm2, %v4051_v5  ;;  %v2772_v5 = vld [vmem:[%s6087_s6 + $0x60] sm:$0xff] }
  0xa1   :  { %3860 = vmatprep.mubr.msk.bf16.mxu1 %vm1508_vm2, %v4052_v16  ;;  %v2790_v16 = vld [vmem:[%s6087_s6 + $0xf0] sm:$0xff] }
  0xa2   :  { %3798 = vmatmul.mubr.msk.f32.gmra.mrb[46].mxu0 %vm498_vm0, %v81_v6  ;;  %2925 = vperm.xlu1 %4041, %v2783_v9   ;;  %v5113_v6 = vpop.permute.xlu1 %375  ;;  %v2803_v9 = vld [vmem:[%s6087_s6 + $0x158] sm:$0xff] }
  0xa3   :  { %3800 = vmatprep.mubr.msk.f32.mxu0 %vm498_vm0, %v82_v7  ;;  %2920 = vperm.xlu0 %4040, %v2782_v10   ;;  %v5115_v7 = vpop.permute.xlu0 %370  ;;  %v2802_v10 = vld [vmem:[%s6087_s6 + $0x150] sm:$0xff] }
  0xa6   :  { %3801 = vmatmul.mubr.msk.f32.gmra.mrb[48].mxu0 %vm498_vm0, %v83_v12  ;;  %2845 = vperm.xlu1 %4041, %v2767_v14   ;;  %v4062_v12 = vld [vmem:[%s6086_s5 + $0xa0] sm:$0xff]   ;;  %v5130_v14 = vpop.permute.xlu1 %225 }
  0xa7   :  { %3803 = vmatprep.mubr.msk.f32.mxu0 %vm498_vm0, %v84_v13  ;;  %2840 = vperm.xlu0 %4040, %v2766_v15   ;;  %v4063_v13 = vld [vmem:[%s6086_s5 + $0xa8] sm:$0xff]   ;;  %v2791_v15 = vld [vmem:[%s6087_s6 + $0xf8] sm:$0xff] }
  0xa8   :  { %3861 = vmatmul.mubr.msk.bf16.gmra.mrb[20].mxu1 %vm1508_vm2, %v4053_v17  ;;  %v5139_v17 = vpop.permute.xlu0 %220 }
  0xa9   :  { %3864 = vmatprep.mubr.msk.bf16.mxu1 %vm1508_vm2, %v4054_v29 }
  0xaa   :  { %3804 = vmatmul.mubr.msk.f32.gmra.mrb[50].mxu0 %vm498_vm0, %v85_v19  ;;  %2995 = vperm.xlu1 %4041, %v2797_v22   ;;  %v2775_v19 = vld [vmem:[%s6087_s6 + $0x78] sm:$0xff]  ;;  %v4064_v22 = vld [vmem:[%s6086_s5 + $0xb0] sm:$0xff]  }
  0xab   :  { %3806 = vmatprep.mubr.msk.f32.mxu0 %vm498_vm0, %v86_v21  ;;  %2990 = vperm.xlu0 %4040, %v2796_v23   ;;  %v2774_v21 = vld [vmem:[%s6087_s6 + $0x70] sm:$0xff]  ;;  %v4065_v23 = vld [vmem:[%s6086_s5 + $0xb8] sm:$0xff]  }
  0xae   :  { %3807 = vmatmul.mubr.msk.f32.gmra.mrb[52].mxu0 %vm498_vm0, %v87_v24  ;;  %2935 = vperm.xlu1 %4041, %v2785_v27   ;;  %v5153_v24 = vpop.permute.xlu1 %385  ;;  %v2805_v27 = vld [vmem:[%s6087_s6 + $0x168] sm:$0xff] }
  0xaf   :  { %3809 = vmatprep.mubr.msk.f32.mxu0 %vm498_vm0, %v88_v25  ;;  %2930 = vperm.xlu0 %4040, %v2784_v28   ;;  %v5156_v25 = vpop.permute.xlu0 %380  ;;  %v2804_v28 = vld [vmem:[%s6087_s6 + $0x160] sm:$0xff] }
  0xb0   :  { %3865 = vmatmul.mubr.msk.bf16.gmra.mrb[24].mxu1 %vm1508_vm2, %v4055_v31  ;;  %v2807_v31 = vld [vmem:[%s6087_s6 + $0x178] sm:$0xff] }
  0xb1   :  { %3868 = vmatprep.mubr.msk.bf16.mxu1 %vm1508_vm2, %v4056_v42 }
  0xb2   :  { %3810 = vmatmul.mubr.msk.f32.gmra.mrb[54].mxu0 %vm498_vm0, %v89_v32  ;;  %2855 = vperm.xlu1 %4041, %v2769_v34   ;;  %v5165_v29 = vpop.permute.xlu1 %235  ;;  %v2806_v32 = vld [vmem:[%s6087_s6 + $0x170] sm:$0xff]  ;;  %s3300_s6 = sshll.u32 %s4238_s17, 4  ;;  %s3301_s6 = int_to_ptr.vmem [resolvable:$true] %s3300_s6 }
  0xb3   :  { %3812 = vmatprep.mubr.msk.f32.mxu0 %vm498_vm0, %v90_v33  ;;  %2850 = vperm.xlu0 %4040, %v2768_v35   ;;  %v4068_v33 = vld [vmem:[%s6085_s4 + $0x4] ss:$16 sps:$4 sm:$0xff]   ;;  %v5176_v34 = vpop.permute.xlu0 %230  ;;  %p4215_p1 = scmp.lt.s32.totalorder %s3301_s6, %s3301_s6 }
  0xb4   :  { %v3147_v35 = vld [vmem:[%s6089_s8] sm:$0xff]  ;;  %s4210_s8 = scalar_lea.vmem %s3301_s6, 128 }
  0xb5   :  { %p4211_p0 = scmp.ne.s32.totalorder %s3301_s6, %s4210_s8  ;;  %p4216_p2 = scmp.lt.s32.totalorder %s4210_s8, %s4210_s8 }
  0xb6   :  { %3813 = vmatmul.mubr.msk.f32.gmra.mrb[56].mxu0 %vm498_vm0, %v91_v37  ;;  %3005 = vperm.xlu1 %4041, %v2799_v40   ;;  %v5181_v37 = vpop.permute.xlu1 %395 }
  0xb7   :  { %3815 = vmatprep.mubr.msk.f32.mxu0 %vm498_vm0, %v92_v39  ;;  %3000 = vperm.xlu0 %4040, %v2798_v41   ;;  %v5183_v39 = vpop.permute.xlu0 %390  ;;  %p4217_p3 = por %p4216_p2, %p4215_p1 }
  0xb8   :  { %3869 = vmatmul.mubr.msk.bf16.gmra.mrb[28].mxu1 %vm1508_vm2, %v4057_v43 }
  0xb9   :  { %3872 = vmatprep.mubr.msk.bf16.mxu1 %vm1508_vm2, %v4058_v54  ;;  %p4218_p4 = pnand %p4217_p3, %p4211_p0 }
  0xba   :  { %3816 = vmatmul.mubr.msk.f32.gmra.mrb[58].mxu0 %vm498_vm0, %v93_v44  ;;  %2945 = vperm.xlu1 %4041, %v2787_v47   ;;  %v5185_v40 = vpop.permute.xlu1 %245 }
  0xbb   :  { %3818 = vmatprep.mubr.msk.f32.mxu0 %vm498_vm0, %v94_v45  ;;  %2940 = vperm.xlu0 %4040, %v2786_v48   ;;  %v5187_v41 = vpop.permute.xlu0 %240 }
  0xbe   :  { %3819 = vmatmul.mubr.msk.f32.gmra.mrb[60].mxu0 %vm498_vm0, %v95_v50  ;;  %2865 = vperm.xlu1 %4041, %v2771_v52   ;;  %v5189_v42 = vpop.permute.xlu1 %405 }
  0xbf   :  { %3821 = vmatprep.mubr.msk.f32.mxu0 %vm498_vm0, %v96_v51  ;;  %2860 = vperm.xlu0 %4040, %v2770_v53   ;;  %v5191_v43 = vpop.permute.xlu0 %400 }
  0xc0   :  { %3873 = vmatmul.mubr.msk.bf16.gmra.mrb[32].mxu1 %vm1508_vm2, %v4059_v55 }
  0xc1   :  { %3876 = vmatprep.mubr.msk.bf16.mxu1 %vm1508_vm2, %v4060_v0 }
  0xc2   :  { %3822 = vmatmul.mubr.msk.f32.gmra.mrb[62].mxu0 %vm498_vm0, %v97_v57  ;;  %3015 = vperm.xlu1 %4041, %v2801_v59   ;;  %v5193_v44 = vpop.permute.xlu1 %255 }
  0xc3   :  { %3010 = vperm.xlu0 %4040, %v2800_v60   ;;  %v5195_v45 = vpop.permute.xlu0 %250 }
  0xc6   :  { %2955 = vperm.xlu1 %4041, %v2789_v62   ;;  %v5197_v47 = vpop.permute.xlu1 %415 }
  0xc7   :  { %2950 = vperm.xlu0 %4040, %v2788_v63   ;;  %v5199_v48 = vpop.permute.xlu0 %410 }
  0xc8   :  { %3877 = vmatmul.mubr.msk.bf16.gmra.mrb[36].mxu1 %vm1508_vm2, %v4061_v2 }
  0xc9   :  { %3880 = vmatprep.mubr.msk.bf16.mxu1 %vm1508_vm2, %v4062_v12 }
  0xca   :  { %2875 = vperm.xlu1 %4041, %v2773_v4   ;;  %v5201_v50 = vpop.permute.xlu1 %265 }
  0xcb   :  { %2870 = vperm.xlu0 %4040, %v2772_v5   ;;  %v5203_v51 = vpop.permute.xlu0 %260 }
  0xce   :  { %3025 = vperm.xlu1 %4041, %v2803_v9   ;;  %v5205_v52 = vpop.permute.xlu1 %425 }
  0xcf   :  { %3020 = vperm.xlu0 %4040, %v2802_v10   ;;  %v5207_v53 = vpop.permute.xlu0 %420 }
  0xd0   :  { %3881 = vmatmul.mubr.msk.bf16.gmra.mrb[40].mxu1 %vm1508_vm2, %v4063_v13 }
  0xd1   :  { %3884 = vmatprep.mubr.msk.bf16.mxu1 %vm1508_vm2, %v4064_v22 }
  0xd2   :  { %2965 = vperm.xlu1 %4041, %v2791_v15   ;;  %v5209_v54 = vpop.permute.xlu1 %275  ;;  %v4094_v15 = vld [vmem:[%s6085_s4 + $0xc] ss:$16 sps:$4 sm:$0xff]  }
  0xd3   :  { %2960 = vperm.xlu0 %4040, %v2790_v16   ;;  %v5211_v55 = vpop.permute.xlu0 %270  ;;  %2567 = vmatprep.mubr.bf16.mxu0 %v4094_v15 }
  0xd6   :  { %2885 = vperm.xlu1 %4041, %v2775_v19   ;;  %v5213_v57 = vpop.permute.xlu1 %435 }
  0xd7   :  { %2880 = vperm.xlu0 %4040, %v2774_v21   ;;  %v5215_v59 = vpop.permute.xlu0 %430 }
  0xd8   :  { %3885 = vmatmul.mubr.msk.bf16.gmra.mrb[44].mxu1 %vm1508_vm2, %v4065_v23 }
  0xd9   :  { %2342 = vmatprep.mubr.bf16.mxu1 %v4068_v33 }
  0xda   :  { %3035 = vperm.xlu1 %4041, %v2805_v27   ;;  %v5217_v60 = vpop.permute.xlu1 %285 }
  0xdb   :  { %3030 = vperm.xlu0 %4040, %v2804_v28   ;;  %v5219_v63 = vpop.permute.xlu0 %280 }
  0xde   :  { %3045 = vperm.xlu1 %4041, %v2807_v31   ;;  %v5227_v16 = vpop.permute.xlu1 %445 }
  0xdf   :  { %3040 = vperm.xlu0 %4040, %v2806_v32   ;;  %v5230_v22 = vpop.permute.xlu0 %440 }
  0xe2   :  { %v5235_v33 = vpop.permute.xlu1 %295 }
  0xe3   :  { %3150 = vperm.xlu0 %4040, %v3147_v35  }
 0x119   :  { %v3730_v62 = vpop.f32.mrb[0].mxu0 }
 0x11a   :  { %v811_v0 = vadd.f32 %v3730_v62, %v4955_v20  ;;  %v805_v2 = vpop.f32.mrb[1].mxu0  ;;  %v5237_v62 = vpop.permute.xlu0 %290 }
 0x11b   :  { %v806_v4 = vadd.f32 %v805_v2, %v4925_v11 }
 0x11c   :  { %v1125_v5 = vmax.f32 %v811_v0, 0.0 }
 0x11d   :  { %v1124_v9 = vmax.f32 %v806_v4, 0.0  ;;  %v3733_v10 = vpop.f32.mrb[2].mxu0 }
 0x11e   :  { %v821_v12 = vadd.f32 %v3733_v10, %v4975_v26  ;;  %v815_v13 = vpop.f32.mrb[3].mxu0 }
 0x11f   :  { %v1284_v19 = vpack.c.bf16 %v1125_v5, %v1124_v9  ;;  %v816_v21 = vadd.f32 %v815_v13, %v4986_v30  ;;  %v5244_v13 = vpop.permute.xlu1 %455 }
 0x120   :  { %v1127_v20 = vmax.f32 %v821_v12, 0.0 }
 0x121   :  { %v1126_v11 = vmax.f32 %v816_v21, 0.0  ;;  %v3736_v23 = vpop.f32.mrb[4].mxu0  ;;  %2311 = vmatpush1.bf16.msra.mxu1 %v1284_v19  ;;  %v5247_v19 = vpop.permute.xlu0 %450 }
 0x122   :  { %v831_v27 = vadd.f32 %v3736_v23, %v5040_v46  ;;  %v825_v26 = vpop.f32.mrb[5].mxu0  ;;  %2312 = vmatprep.subr.bf16.mxu1 %v4234_v3 }
 0x123   :  { %v1285_v28 = vpack.c.bf16 %v1127_v20, %v1126_v11  ;;  %v826_v31 = vadd.f32 %v825_v26, %v5049_v49 }
 0x124   :  { %v1129_v32 = vmax.f32 %v831_v27, 0.0 }
 0x125   :  { %v1128_v35 = vmax.f32 %v826_v31, 0.0  ;;  %v3739_v30 = vpop.f32.mrb[6].mxu0  ;;  %2313 = vmatpush1.bf16.msra.mxu1 %v1285_v28  ;;  %v5252_v28 = vpop.permute.xlu1 %305 }
 0x126   :  { %v841_v0 = vadd.f32 %v3739_v30, %v5089_v61  ;;  %v835_v2 = vpop.f32.mrb[7].mxu0  ;;  %2314 = vmatprep.subr.bf16.mxu1 %v4234_v3 }
 0x127   :  { %v1286_v46 = vpack.c.bf16 %v1129_v32, %v1128_v35  ;;  %v836_v4 = vadd.f32 %v835_v2, %v5100_v1 }
 0x128   :  { %v1131_v5 = vmax.f32 %v841_v0, 0.0 }
 0x129   :  { %v1130_v9 = vmax.f32 %v836_v4, 0.0  ;;  %v3742_v10 = vpop.f32.mrb[8].mxu0  ;;  %2315 = vmatpush1.bf16.msra.mxu1 %v1286_v46 }
 0x12a   :  { %v851_v49 = vadd.f32 %v3742_v10, %v5130_v14  ;;  %v845_v12 = vpop.f32.mrb[9].mxu0  ;;  %2316 = vmatprep.subr.bf16.mxu1 %v4234_v3 }
 0x12b   :  { %v1287_v15 = vpack.c.bf16 %v1131_v5, %v1130_v9  ;;  %v846_v61 = vadd.f32 %v845_v12, %v5139_v17  ;;  %v5254_v17 = vpop.permute.xlu0 %300  ;;  %v5261_v9 = vpop.permute.xlu1 %465 }
 0x12c   :  { %v1133_v21 = vmax.f32 %v851_v49, 0.0 }
 0x12d   :  { %v1132_v20 = vmax.f32 %v846_v61, 0.0  ;;  %v3745_v11 = vpop.f32.mrb[10].mxu0  ;;  %2317 = vmatpush1.bf16.msra.mxu1 %v1287_v15 }
 0x12e   :  { %v861_v1 = vadd.f32 %v3745_v11, %v5165_v29  ;;  %v855_v23 = vpop.f32.mrb[11].mxu0  ;;  %2318 = vmatprep.subr.bf16.mxu1 %v4234_v3 }
 0x12f   :  { %v1288_v14 = vpack.c.bf16 %v1133_v21, %v1132_v20  ;;  %v856_v27 = vadd.f32 %v855_v23, %v5176_v34  ;;  %v5264_v49 = vpop.permute.xlu0 %460 }
 0x130   :  { %v1135_v26 = vmax.f32 %v861_v1, 0.0  ;;  %v316_v1 = vpop.permute.xlu1 %315 }
 0x131   :  { %v1134_v31 = vmax.f32 %v856_v27, 0.0  ;;  %v3748_v32 = vpop.f32.mrb[12].mxu0  ;;  %2319 = vmatpush1.bf16.msra.mxu1 %v1288_v14 }
 0x132   :  { %v871_v35 = vadd.f32 %v3748_v32, %v5185_v40  ;;  %v865_v30 = vpop.f32.mrb[13].mxu0  ;;  %2320 = vmatprep.subr.bf16.mxu1 %v4234_v3 }
 0x133   :  { %v1289_v29 = vpack.c.bf16 %v1135_v26, %v1134_v31  ;;  %v866_v0 = vadd.f32 %v865_v30, %v5187_v41 }
 0x134   :  { %v1137_v2 = vmax.f32 %v871_v35, 0.0 }
 0x135   :  { %v1136_v46 = vmax.f32 %v866_v0, 0.0  ;;  %v3751_v4 = vpop.f32.mrb[14].mxu0  ;;  %2321 = vmatpush1.bf16.msra.mxu1 %v1289_v29  ;;  %v5274_v0 = vpop.permute.xlu1 %475 }
 0x136   :  { %v881_v34 = vadd.f32 %v3751_v4, %v5193_v44  ;;  %v875_v5 = vpop.f32.mrb[15].mxu0  ;;  %2322 = vmatprep.subr.bf16.mxu1 %v4234_v3 }
 0x137   :  { %v1290_v10 = vpack.c.bf16 %v1137_v2, %v1136_v46  ;;  %v876_v40 = vadd.f32 %v875_v5, %v5195_v45  ;;  %v311_v45 = vpop.permute.xlu0 %310 }
 0x138   :  { %v1139_v12 = vmax.f32 %v881_v34, 0.0 }
 0x139   :  { %v1138_v15 = vmax.f32 %v876_v40, 0.0  ;;  %v3754_v61 = vpop.f32.mrb[16].mxu0  ;;  %2323 = vmatpush1.bf16.msra.mxu1 %v1290_v10 }
 0x13a   :  { %v891_v41 = vadd.f32 %v3754_v61, %v5201_v50  ;;  %v885_v21 = vpop.f32.mrb[17].mxu0  ;;  %2324 = vmatprep.subr.bf16.mxu1 %v4234_v3 }
 0x13b   :  { %v1291_v44 = vpack.c.bf16 %v1139_v12, %v1138_v15  ;;  %v886_v20 = vadd.f32 %v885_v21, %v5203_v51  ;;  %v5277_v46 = vpop.permute.xlu0 %470  ;;  %v326_v15 = vpop.permute.xlu1 %325 }
 0x13c   :  { %v1141_v11 = vmax.f32 %v891_v41, 0.0 }
 0x13d   :  { %v1140_v23 = vmax.f32 %v886_v20, 0.0  ;;  %v3757_v14 = vpop.f32.mrb[18].mxu0  ;;  %2325 = vmatpush1.bf16.msra.mxu1 %v1291_v44 }
 0x13e   :  { %v901_v27 = vadd.f32 %v3757_v14, %v5209_v54  ;;  %v895_v26 = vpop.f32.mrb[19].mxu0  ;;  %2326 = vmatprep.subr.bf16.mxu1 %v4234_v3 }
 0x13f   :  { %v1292_v31 = vpack.c.bf16 %v1141_v11, %v1140_v23  ;;  %v896_v50 = vadd.f32 %v895_v26, %v5211_v55  ;;  %v5286_v26 = vpop.permute.xlu1 %485 }
 0x140   :  { %v1143_v32 = vmax.f32 %v901_v27, 0.0 }
 0x141   :  { %v1142_v35 = vmax.f32 %v896_v50, 0.0  ;;  %v3760_v30 = vpop.f32.mrb[20].mxu0  ;;  %2327 = vmatpush1.bf16.msra.mxu1 %v1292_v31 }
 0x142   :  { %v911_v51 = vadd.f32 %v3760_v30, %v5217_v60  ;;  %v905_v29 = vpop.f32.mrb[21].mxu0  ;;  %2328 = vmatprep.subr.bf16.mxu1 %v4234_v3 }
 0x143   :  { %v1293_v2 = vpack.c.bf16 %v1143_v32, %v1142_v35  ;;  %v906_v54 = vadd.f32 %v905_v29, %v5219_v63  ;;  %v321_v63 = vpop.permute.xlu0 %320 }
 0x144   :  { %v1145_v4 = vmax.f32 %v911_v51, 0.0 }
 0x145   :  { %v1144_v34 = vmax.f32 %v906_v54, 0.0  ;;  %v3763_v5 = vpop.f32.mrb[22].mxu0  ;;  %2329 = vmatpush1.bf16.msra.mxu1 %v1293_v2  ;;  %v336_v54 = vpop.permute.xlu1 %335 }
 0x146   :  { %v921_v55 = vadd.f32 %v3763_v5, %v5235_v33  ;;  %v915_v10 = vpop.f32.mrb[23].mxu0  ;;  %2330 = vmatprep.subr.bf16.mxu1 %v4234_v3 }
 0x147   :  { %v1294_v60 = vpack.c.bf16 %v1145_v4, %v1144_v34  ;;  %v916_v40 = vadd.f32 %v915_v10, %v5237_v62  ;;  %v5288_v32 = vpop.permute.xlu0 %480 }
 0x148   :  { %v1147_v12 = vmax.f32 %v921_v55, 0.0 }
 0x149   :  { %v1146_v61 = vmax.f32 %v916_v40, 0.0  ;;  %v3766_v41 = vpop.f32.mrb[24].mxu0  ;;  %2331 = vmatpush1.bf16.msra.mxu1 %v1294_v60 }
 0x14a   :  { %v931_v21 = vadd.f32 %v3766_v41, %v5252_v28  ;;  %v925_v44 = vpop.f32.mrb[25].mxu0  ;;  %2332 = vmatprep.subr.bf16.mxu1 %v4234_v3 }
 0x14b   :  { %v1295_v20 = vpack.c.bf16 %v1147_v12, %v1146_v61  ;;  %v926_v33 = vadd.f32 %v925_v44, %v5254_v17  ;;  %v331_v5 = vpop.permute.xlu0 %330 }
 0x14c   :  { %v1149_v11 = vmax.f32 %v931_v21, 0.0 }
 0x14d   :  { %v1148_v23 = vmax.f32 %v926_v33, 0.0  ;;  %v3769_v14 = vpop.f32.mrb[26].mxu0  ;;  %2333 = vmatpush1.bf16.msra.mxu1 %v1295_v20  ;;  %v4066_v20 = vld [vmem:[%s6085_s4] ss:$16 sps:$4 sm:$0xff]  }
 0x14e   :  { %v941_v27 = vadd.f32 %v3769_v14, %v316_v1  ;;  %v935_v62 = vpop.f32.mrb[27].mxu0  ;;  %2334 = vmatprep.subr.bf16.mxu1 %v4234_v3 }
 0x14f   :  { %v1296_v31 = vpack.c.bf16 %v1149_v11, %v1148_v23  ;;  %v936_v50 = vadd.f32 %v935_v62, %v311_v45  ;;  %v4069_v23 = vld [vmem:[%s6085_s4 + $0x24] ss:$16 sps:$4 sm:$0xff]  }
 0x150   :  { %v1151_v28 = vmax.f32 %v941_v27, 0.0 }
 0x151   :  { %v1150_v35 = vmax.f32 %v936_v50, 0.0  ;;  %v3772_v30 = vpop.f32.mrb[28].mxu0  ;;  %2335 = vmatpush1.bf16.msra.mxu1 %v1296_v31 }
 0x152   :  { %v951_v51 = vadd.f32 %v3772_v30, %v326_v15  ;;  %v945_v17 = vpop.f32.mrb[29].mxu0  ;;  %2336 = vmatprep.subr.bf16.mxu1 %v4234_v3 }
 0x153   :  { %v1297_v29 = vpack.c.bf16 %v1151_v28, %v1150_v35  ;;  %v946_v2 = vadd.f32 %v945_v17, %v321_v63 }
 0x154   :  { %v1153_v1 = vmax.f32 %v951_v51, 0.0 }
 0x155   :  { %v1152_v4 = vmax.f32 %v946_v2, 0.0  ;;  %v3775_v34 = vpop.f32.mrb[30].mxu0  ;;  %2337 = vmatpush1.bf16.msra.mxu1 %v1297_v29  ;;  %v4072_v2 = vld [vmem:[%s6085_s4 + $0x44] ss:$16 sps:$4 sm:$0xff]  }
 0x156   :  { %v961_v55 = vadd.f32 %v3775_v34, %v336_v54  ;;  %v955_v45 = vpop.f32.mrb[31].mxu0  ;;  %2338 = vmatprep.subr.bf16.mxu1 %v4234_v3 }
 0x157   :  { %v1298_v10 = vpack.c.bf16 %v1153_v1, %v1152_v4  ;;  %v956_v60 = vadd.f32 %v955_v45, %v331_v5 }
 0x158   :  { %v1155_v40 = vmax.f32 %v961_v55, 0.0 }
 0x159   :  { %v1154_v12 = vmax.f32 %v956_v60, 0.0  ;;  %v3778_v15 = vpop.f32.mrb[32].mxu0  ;;  %2339 = vmatpush1.bf16.msra.mxu1 %v1298_v10 }
 0x15a   :  { %v971_v61 = vadd.f32 %v3778_v15, %v4948_v18  ;;  %v965_v41 = vpop.f32.mrb[33].mxu0  ;;  %2340 = vmatprep.subr.bf16.mxu1 %v4234_v3  ;;  %v4075_v15 = vld [vmem:[%s6085_s4 + $0x64] ss:$16 sps:$4 sm:$0xff]  }
 0x15b   :  { %v1299_v63 = vpack.c.bf16 %v1155_v40, %v1154_v12  ;;  %v966_v21 = vadd.f32 %v965_v41, %v4916_v8  ;;  %v4074_v40 = vld [vmem:[%s6085_s4 + $0x40] ss:$16 sps:$4 sm:$0xff]  }
 0x15c   :  { %v1157_v44 = vmax.f32 %v971_v61, 0.0 }
 0x15d   :  { %v1156_v33 = vmax.f32 %v966_v21, 0.0  ;;  %v3781_v11 = vpop.f32.mrb[34].mxu0  ;;  %2341 = vmatpush1.bf16.msra.mxu1 %v1299_v63 }
 0x15e   :  { %v981_v18 = vadd.f32 %v3781_v11, %v5008_v36  ;;  %v975_v14 = vpop.f32.mrb[35].mxu0  ;;  %v4071_v36 = vld [vmem:[%s6085_s4 + $0x20] ss:$16 sps:$4 sm:$0xff]  }
 0x15f   :  { %v1300_v27 = vpack.c.bf16 %v1157_v44, %v1156_v33  ;;  %v976_v62 = vadd.f32 %v975_v14, %v5014_v38 }
 0x160   :  { %v1159_v31 = vmax.f32 %v981_v18, 0.0  ;;  %2343 = vmatmul.mubr.bf16.vlgmr.msra.gmra.mrb[48].mxu1 %v4066_v20  ;;  %v4077_v18 = vld [vmem:[%s6085_s4 + $0x60] ss:$16 sps:$4 sm:$0xff]  }
 0x161   :  { %v1158_v8 = vmax.f32 %v976_v62, 0.0  ;;  %v3784_v50 = vpop.f32.mrb[36].mxu0  ;;  %2536 = vmatpush1.bf16.msra.mxu0 %v1300_v27  ;;  %2350 = vmatprep.mubr.bf16.mxu1 %v4069_v23  ;;  %v4078_v27 = vld [vmem:[%s6085_s4 + $0x84] ss:$16 sps:$4 sm:$0xff]  }
 0x162   :  { %v991_v28 = vadd.f32 %v3784_v50, %v5072_v56  ;;  %v985_v35 = vpop.f32.mrb[37].mxu0  ;;  %2537 = vmatprep.subr.bf16.mxu0 %v4234_v3 }
 0x163   :  { %v1301_v30 = vpack.c.bf16 %v1159_v31, %v1158_v8  ;;  %v986_v51 = vadd.f32 %v985_v35, %v5079_v58 }
 0x164   :  { %v1161_v17 = vmax.f32 %v991_v28, 0.0 }
 0x165   :  { %v1160_v38 = vmax.f32 %v986_v51, 0.0  ;;  %v3787_v29 = vpop.f32.mrb[38].mxu0  ;;  %2538 = vmatpush1.bf16.msra.mxu0 %v1301_v30 }
 0x166   :  { %v1001_v56 = vadd.f32 %v3787_v29, %v5113_v6  ;;  %v995_v1 = vpop.f32.mrb[39].mxu0  ;;  %2539 = vmatprep.subr.bf16.mxu0 %v4234_v3  ;;  %v4081_v29 = vld [vmem:[%s6085_s4 + $0xa4] ss:$16 sps:$4 sm:$0xff]  }
 0x167   :  { %v1302_v54 = vpack.c.bf16 %v1161_v17, %v1160_v38  ;;  %v996_v58 = vadd.f32 %v995_v1, %v5115_v7 }
 0x168   :  { %v1163_v4 = vmax.f32 %v1001_v56, 0.0  ;;  %2351 = vmatmul.mubr.bf16.gmra.mrb[52].mxu1 %v4071_v36  ;;  %v4080_v36 = vld [vmem:[%s6085_s4 + $0x80] ss:$16 sps:$4 sm:$0xff]  }
 0x169   :  { %v1162_v34 = vmax.f32 %v996_v58, 0.0  ;;  %v3790_v5 = vpop.f32.mrb[40].mxu0  ;;  %2540 = vmatpush1.bf16.msra.mxu0 %v1302_v54  ;;  %2358 = vmatprep.mubr.bf16.mxu1 %v4072_v2  ;;  %v5351_v54 = vpop.f32.mrb[0].mxu1 }
 0x16a   :  { %v1011_v55 = vadd.f32 %v3790_v5, %v5153_v24  ;;  %v1005_v45 = vpop.f32.mrb[41].mxu0  ;;  %2541 = vmatprep.subr.bf16.mxu0 %v4234_v3 }
 0x16b   :  { %v1303_v10 = vpack.c.bf16 %v1163_v4, %v1162_v34  ;;  %v1006_v6 = vadd.f32 %v1005_v45, %v5156_v25  ;;  %v5353_v34 = vpop.f32.mrb[1].mxu1 }
 0x16c   :  { %v1165_v60 = vmax.f32 %v1011_v55, 0.0 }
 0x16d   :  { %v1164_v7 = vmax.f32 %v1006_v6, 0.0  ;;  %v3793_v12 = vpop.f32.mrb[42].mxu0  ;;  %2542 = vmatpush1.bf16.msra.mxu0 %v1303_v10 }
 0x16e   :  { %v1021_v24 = vadd.f32 %v3793_v12, %v5181_v37  ;;  %v1015_v61 = vpop.f32.mrb[43].mxu0  ;;  %2543 = vmatprep.subr.bf16.mxu0 %v4234_v3 }
 0x16f   :  { %v1304_v41 = vpack.c.bf16 %v1165_v60, %v1164_v7  ;;  %v1016_v25 = vadd.f32 %v1015_v61, %v5183_v39  ;;  %v4083_v60 = vld [vmem:[%s6085_s4 + $0xa0] ss:$16 sps:$4 sm:$0xff]  }
 0x170   :  { %v1167_v63 = vmax.f32 %v1021_v24, 0.0  ;;  %2359 = vmatmul.mubr.bf16.gmra.mrb[56].mxu1 %v4074_v40 }
 0x171   :  { %v1166_v21 = vmax.f32 %v1016_v25, 0.0  ;;  %v3796_v44 = vpop.f32.mrb[44].mxu0  ;;  %2544 = vmatpush1.bf16.msra.mxu0 %v1304_v41  ;;  %2366 = vmatprep.mubr.bf16.mxu1 %v4075_v15 }
 0x172   :  { %v1031_v20 = vadd.f32 %v3796_v44, %v5189_v42  ;;  %v1025_v33 = vpop.f32.mrb[45].mxu0  ;;  %2545 = vmatprep.subr.bf16.mxu0 %v4234_v3 }
 0x173   :  { %v1305_v11 = vpack.c.bf16 %v1167_v63, %v1166_v21  ;;  %v1026_v37 = vadd.f32 %v1025_v33, %v5191_v43 }
 0x174   :  { %v1169_v23 = vmax.f32 %v1031_v20, 0.0 }
 0x175   :  { %v1168_v39 = vmax.f32 %v1026_v37, 0.0  ;;  %v3799_v14 = vpop.f32.mrb[46].mxu0  ;;  %2546 = vmatpush1.bf16.msra.mxu0 %v1305_v11 }
 0x176   :  { %v1041_v42 = vadd.f32 %v3799_v14, %v5197_v47  ;;  %v1035_v62 = vpop.f32.mrb[47].mxu0  ;;  %2547 = vmatprep.subr.bf16.mxu0 %v4234_v3 }
 0x177   :  { %v1306_v31 = vpack.c.bf16 %v1169_v23, %v1168_v39  ;;  %v1036_v43 = vadd.f32 %v1035_v62, %v5199_v48  ;;  %v4086_v39 = vld [vmem:[%s6085_s4 + $0xc0] ss:$16 sps:$4 sm:$0xff]  }
 0x178   :  { %v1171_v8 = vmax.f32 %v1041_v42, 0.0  ;;  %2367 = vmatmul.mubr.bf16.gmra.mrb[60].mxu1 %v4077_v18 }
 0x179   :  { %v1170_v50 = vmax.f32 %v1036_v43, 0.0  ;;  %v3802_v28 = vpop.f32.mrb[48].mxu0  ;;  %2548 = vmatpush1.bf16.msra.mxu0 %v1306_v31  ;;  %2374 = vmatprep.mubr.bf16.mxu1 %v4078_v27 }
 0x17a   :  { %v1051_v35 = vadd.f32 %v3802_v28, %v5205_v52  ;;  %v1045_v30 = vpop.f32.mrb[49].mxu0  ;;  %2549 = vmatprep.subr.bf16.mxu0 %v4234_v3 }
 0x17b   :  { %v1307_v51 = vpack.c.bf16 %v1171_v8, %v1170_v50  ;;  %v1046_v47 = vadd.f32 %v1045_v30, %v5207_v53 }
 0x17c   :  { %v1173_v17 = vmax.f32 %v1051_v35, 0.0 }
 0x17d   :  { %v1172_v48 = vmax.f32 %v1046_v47, 0.0  ;;  %v3805_v38 = vpop.f32.mrb[50].mxu0  ;;  %2550 = vmatpush1.bf16.msra.mxu0 %v1307_v51 }
 0x17e   :  { %v1061_v52 = vadd.f32 %v3805_v38, %v5213_v57  ;;  %v1055_v2 = vpop.f32.mrb[51].mxu0  ;;  %2551 = vmatprep.subr.bf16.mxu0 %v4234_v3  ;;  %v5357_v57 = vpop.f32.mrb[2].mxu1 }
 0x17f   :  { %v1308_v56 = vpack.c.bf16 %v1173_v17, %v1172_v48  ;;  %v1056_v53 = vadd.f32 %v1055_v2, %v5215_v59  ;;  %v5360_v10 = vpop.f32.mrb[3].mxu1  ;;  %v491_v2 = vpop.permute.xlu0 %490 }
 0x180   :  { %v1175_v1 = vmax.f32 %v1061_v52, 0.0  ;;  %2375 = vmatmul.mubr.bf16.gmra.mrb[64].mxu1 %v4080_v36  ;;  %v5365_v40 = vpop.f32.mrb[4].mxu1 }
 0x181   :  { %v1174_v58 = vmax.f32 %v1056_v53, 0.0  ;;  %v3808_v4 = vpop.f32.mrb[52].mxu0  ;;  %2552 = vmatpush1.bf16.msra.mxu0 %v1308_v56  ;;  %2382 = vmatprep.mubr.bf16.mxu1 %v4081_v29  ;;  %v5370_v15 = vpop.f32.mrb[5].mxu1  ;;  %v4089_v53 = vld [vmem:[%s6085_s4 + $0xe0] ss:$16 sps:$4 sm:$0xff]  }
 0x182   :  { %v1071_v5 = vadd.f32 %v3808_v4, %v5227_v16  ;;  %v1065_v55 = vpop.f32.mrb[53].mxu0  ;;  %2553 = vmatprep.subr.bf16.mxu0 %v4234_v3  ;;  %v4084_v16 = vld [vmem:[%s6085_s4 + $0xc4] ss:$16 sps:$4 sm:$0xff]   ;;  %v5375_v63 = vpop.f32.mrb[6].mxu1 }
 0x183   :  { %v1309_v45 = vpack.c.bf16 %v1175_v1, %v1174_v58  ;;  %v1066_v59 = vadd.f32 %v1065_v55, %v5230_v22  ;;  %v5377_v20 = vpop.f32.mrb[7].mxu1  ;;  %v4090_v4 = vld [vmem:[%s6085_s4 + $0x104] ss:$16 sps:$4 sm:$0xff]  }
 0x184   :  { %v1177_v6 = vmax.f32 %v1071_v5, 0.0 }
 0x185   :  { %v1176_v7 = vmax.f32 %v1066_v59, 0.0  ;;  %v3811_v12 = vpop.f32.mrb[54].mxu0  ;;  %2554 = vmatpush1.bf16.msra.mxu0 %v1309_v45 }
 0x186   :  { %v1081_v22 = vadd.f32 %v3811_v12, %v5244_v13  ;;  %v1075_v24 = vpop.f32.mrb[55].mxu0  ;;  %2555 = vmatprep.subr.bf16.mxu0 %v4234_v3  ;;  %v5381_v13 = vpop.f32.mrb[8].mxu1 }
 0x187   :  { %v1310_v61 = vpack.c.bf16 %v1177_v6, %v1176_v7  ;;  %v1076_v41 = vadd.f32 %v1075_v24, %v5247_v19  ;;  %v5384_v23 = vpop.f32.mrb[9].mxu1 }
 0x188   :  { %v1179_v25 = vmax.f32 %v1081_v22, 0.0  ;;  %2383 = vmatmul.mubr.bf16.gmra.mrb[68].mxu1 %v4083_v60  ;;  %v5389_v14 = vpop.f32.mrb[10].mxu1 }
 0x189   :  { %v1178_v21 = vmax.f32 %v1076_v41, 0.0  ;;  %v3814_v44 = vpop.f32.mrb[56].mxu0  ;;  %2556 = vmatpush1.bf16.msra.mxu0 %v1310_v61  ;;  %2390 = vmatprep.mubr.bf16.mxu1 %v4084_v16  ;;  %v5394_v62 = vpop.f32.mrb[11].mxu1 }
 0x18a   :  { %v1091_v33 = vadd.f32 %v3814_v44, %v5261_v9  ;;  %v1085_v11 = vpop.f32.mrb[57].mxu0  ;;  %2557 = vmatprep.subr.bf16.mxu0 %v4234_v3  ;;  %v4087_v9 = vld [vmem:[%s6085_s4 + $0xe4] ss:$16 sps:$4 sm:$0xff]   ;;  %v5398_v43 = vpop.f32.mrb[12].mxu1 }
 0x18b   :  { %v1311_v37 = vpack.c.bf16 %v1179_v25, %v1178_v21  ;;  %v1086_v19 = vadd.f32 %v1085_v11, %v5264_v49  ;;  %v5401_v28 = vpop.f32.mrb[13].mxu1  ;;  %v4092_v25 = vld [vmem:[%s6085_s4 + $0x8] ss:$16 sps:$4 sm:$0xff]   ;;  %v4095_v21 = vld [vmem:[%s6085_s4 + $0x100] ss:$16 sps:$4 sm:$0xff]  }
 0x18c   :  { %v1181_v18 = vmax.f32 %v1091_v33, 0.0  ;;  %v5403_v30 = vpop.f32.mrb[14].mxu1  ;;  %v4098_v33 = vld [vmem:[%s6085_s4 + $0x2c] ss:$16 sps:$4 sm:$0xff]  }
 0x18d   :  { %v1180_v27 = vmax.f32 %v1086_v19, 0.0  ;;  %v3817_v42 = vpop.f32.mrb[58].mxu0  ;;  %2558 = vmatpush1.bf16.msra.mxu0 %v1311_v37  ;;  %v5405_v17 = vpop.f32.mrb[15].mxu1 }
 0x18e   :  { %v1101_v49 = vadd.f32 %v3817_v42, %v5274_v0  ;;  %v1095_v31 = vpop.f32.mrb[59].mxu0  ;;  %2559 = vmatprep.subr.bf16.mxu0 %v4234_v3  ;;  %v5409_v48 = vpop.f32.mrb[16].mxu1 }
 0x18f   :  { %v1312_v8 = vpack.c.bf16 %v1181_v18, %v1180_v27  ;;  %v1096_v50 = vadd.f32 %v1095_v31, %v5277_v46  ;;  %v496_v46 = vpop.permute.xlu1 %495  ;;  %v5412_v52 = vpop.f32.mrb[17].mxu1 }
 0x190   :  { %v1183_v35 = vmax.f32 %v1101_v49, 0.0  ;;  %2391 = vmatmul.mubr.bf16.gmra.mrb[72].mxu1 %v4086_v39  ;;  %v5417_v1 = vpop.f32.mrb[18].mxu1  ;;  %v4101_v49 = vld [vmem:[%s6085_s4 + $0x28] ss:$16 sps:$4 sm:$0xff]  }
 0x191   :  { %v1182_v51 = vmax.f32 %v1096_v50, 0.0  ;;  %v3820_v47 = vpop.f32.mrb[60].mxu0  ;;  %2560 = vmatpush1.bf16.msra.mxu0 %v1312_v8  ;;  %2398 = vmatprep.mubr.bf16.mxu1 %v4087_v9  ;;  %v5422_v5 = vpop.f32.mrb[19].mxu1  ;;  %v4100_v9 = vld [vmem:[%s6085_s4 + $0x120] ss:$16 sps:$4 sm:$0xff]  }
 0x192   :  { %v1111_v0 = vadd.f32 %v3820_v47, %v5286_v26  ;;  %v1105_v36 = vpop.f32.mrb[61].mxu0  ;;  %2561 = vmatprep.subr.bf16.mxu0 %v4234_v3  ;;  %v5425_v45 = vpop.f32.mrb[20].mxu1  ;;  %v4102_v8 = vld [vmem:[%s6085_s4 + $0x144] ss:$16 sps:$4 sm:$0xff]   ;;  %v4104_v50 = vld [vmem:[%s6085_s4 + $0x4c] ss:$16 sps:$4 sm:$0xff]  }
 0x193   :  { %v1313_v38 = vpack.c.bf16 %v1183_v35, %v1182_v51  ;;  %v1106_v29 = vadd.f32 %v1105_v36, %v5288_v32  ;;  %v5427_v60 = vpop.f32.mrb[21].mxu1 }
 0x194   :  { %v1185_v56 = vmax.f32 %v1111_v0, 0.0  ;;  %v5429_v12 = vpop.f32.mrb[22].mxu1 }
 0x195   :  { %v1184_v26 = vmax.f32 %v1106_v29, 0.0  ;;  %v3823_v58 = vpop.f32.mrb[62].mxu0  ;;  %2562 = vmatpush1.bf16.msra.mxu0 %v1313_v38  ;;  %v5431_v22 = vpop.f32.mrb[23].mxu1  ;;  %v4106_v29 = vld [vmem:[%s6085_s4 + $0x140] ss:$16 sps:$4 sm:$0xff]  }
 0x196   :  { %v1121_v32 = vadd.f32 %v3823_v58, %v496_v46  ;;  %v1115_v55 = vpop.f32.mrb[63].mxu0  ;;  %2563 = vmatprep.subr.bf16.mxu0 %v4234_v3  ;;  %v5434_v24 = vpop.f32.mrb[24].mxu1 }
 0x197   :  { %v1314_v59 = vpack.c.bf16 %v1185_v56, %v1184_v26  ;;  %v1116_v6 = vadd.f32 %v1115_v55, %v491_v2  ;;  %v5436_v41 = vpop.f32.mrb[25].mxu1  ;;  %v4107_v2 = vld [vmem:[%s6085_s4 + $0x48] ss:$16 sps:$4 sm:$0xff]   ;;  %v4110_v26 = vld [vmem:[%s6085_s4 + $0x6c] ss:$16 sps:$4 sm:$0xff]  }
 0x198   :  { %v1187_v7 = vmax.f32 %v1121_v32, 0.0  ;;  %2399 = vmatmul.mubr.bf16.gmra.mrb[76].mxu1 %v4089_v53  ;;  %v5444_v44 = vpop.f32.mrb[26].mxu1  ;;  %v4108_v53 = vld [vmem:[%s6085_s4 + $0x164] ss:$16 sps:$4 sm:$0xff]  }
 0x199   :  { %v1186_v16 = vmax.f32 %v1116_v6, 0.0  ;;  %2564 = vmatpush1.bf16.msra.mxu0 %v1314_v59  ;;  %2406 = vmatprep.mubr.bf16.mxu1 %v4090_v4  ;;  %v5452_v11 = vpop.f32.mrb[27].mxu1  ;;  %v4112_v6 = vld [vmem:[%s6085_s4 + $0x160] ss:$16 sps:$4 sm:$0xff]  }
 0x19a   :  { %2565 = vmatprep.subr.bf16.mxu0 %v4234_v3  ;;  %v4096_v3 = vld [vmem:[%s6085_s4 + $0x124] ss:$16 sps:$4 sm:$0xff]   ;;  %v5454_v37 = vpop.f32.mrb[28].mxu1 }
 0x19b   :  { %v1315_v61 = vpack.c.bf16 %v1187_v7, %v1186_v16  ;;  %v5456_v19 = vpop.f32.mrb[29].mxu1  ;;  %v4113_v7 = vld [vmem:[%s6085_s4 + $0x68] ss:$16 sps:$4 sm:$0xff]   ;;  %v4114_v16 = vld [vmem:[%s6085_s4 + $0x184] ss:$16 sps:$4 sm:$0xff]  }
 0x19c   :  { %v5458_v18 = vpop.f32.mrb[30].mxu1 }
 0x19d   :  { %2566 = vmatpush1.bf16.msra.mxu0 %v1315_v61  ;;  %v5460_v39 = vpop.f32.mrb[31].mxu1  ;;  %v4116_v61 = vld [vmem:[%s6085_s4 + $0x8c] ss:$16 sps:$4 sm:$0xff]  }
 0x19e   :  { %v5462_v27 = vpop.f32.mrb[32].mxu1 }
 0x19f   :  { %v5464_v42 = vpop.f32.mrb[33].mxu1 }
 0x1a0   :  { %2407 = vmatmul.mubr.bf16.gmra.mrb[80].mxu1 %v4095_v21  ;;  %2568 = vmatmul.mubr.bf16.vlgmr.msra.gmra.mrb[64].mxu0 %v4092_v25  ;;  %v5472_v31 = vpop.f32.mrb[34].mxu1  ;;  %v4118_v25 = vld [vmem:[%s6085_s4 + $0x180] ss:$16 sps:$4 sm:$0xff]   ;;  %v4119_v21 = vld [vmem:[%s6085_s4 + $0x88] ss:$16 sps:$4 sm:$0xff]  }
 0x1a1   :  { %2414 = vmatprep.mubr.bf16.mxu1 %v4096_v3  ;;  %2575 = vmatprep.mubr.bf16.mxu0 %v4098_v33  ;;  %v5480_v35 = vpop.f32.mrb[35].mxu1  ;;  %v4120_v3 = vld [vmem:[%s6085_s4 + $0x1a4] ss:$16 sps:$4 sm:$0xff]   ;;  %v4122_v33 = vld [vmem:[%s6085_s4 + $0xac] ss:$16 sps:$4 sm:$0xff]  }
 0x1a2   :  { %v5482_v51 = vpop.f32.mrb[36].mxu1 }
 0x1a3   :  { %6095 = vst [vmem:[#allocation5_spill] sm:$0xff] %v5482_v51  ;;  %v5484_v47 = vpop.f32.mrb[37].mxu1 }
 0x1a4   :  { %6096 = vst [vmem:[#allocation6_spill] sm:$0xff] %v5484_v47  ;;  %v5486_v0 = vpop.f32.mrb[38].mxu1 }
 0x1a5   :  { %6097 = vst [vmem:[#allocation7_spill] sm:$0xff] %v5486_v0  ;;  %v5488_v36 = vpop.f32.mrb[39].mxu1 }
 0x1a6   :  { %6098 = vst [vmem:[#allocation8_spill] sm:$0xff] %v5488_v36  ;;  %v5490_v46 = vpop.f32.mrb[40].mxu1 }
 0x1a7   :  { %6099 = vst [vmem:[#allocation9_spill] sm:$0xff] %v5490_v46  ;;  %v5492_v38 = vpop.f32.mrb[41].mxu1  ;;  %v4206_v46 = vld [vmem:[%s6085_s4 + $0x2c8] ss:$16 sps:$4 sm:$0xff]  }
 0x1a8   :  { %2415 = vmatmul.mubr.bf16.gmra.mrb[84].mxu1 %v4100_v9  ;;  %2576 = vmatmul.mubr.bf16.gmra.mrb[68].mxu0 %v4101_v49  ;;  %6100 = vst [vmem:[#allocation10_spill] sm:$0xff] %v5492_v38  ;;  %v5500_v56 = vpop.f32.mrb[42].mxu1  ;;  %v4124_v9 = vld [vmem:[%s6085_s4 + $0x1a0] ss:$16 sps:$4 sm:$0xff]   ;;  %v4125_v49 = vld [vmem:[%s6085_s4 + $0xa8] ss:$16 sps:$4 sm:$0xff]  }
 0x1a9   :  { %2422 = vmatprep.mubr.bf16.mxu1 %v4102_v8  ;;  %2583 = vmatprep.mubr.bf16.mxu0 %v4104_v50  ;;  %6101 = vst [vmem:[#allocation11_spill] sm:$0xff] %v5500_v56  ;;  %v5508_v58 = vpop.f32.mrb[43].mxu1  ;;  %v4126_v8 = vld [vmem:[%s6085_s4 + $0x1c4] ss:$16 sps:$4 sm:$0xff]   ;;  %v4128_v50 = vld [vmem:[%s6085_s4 + $0xcc] ss:$16 sps:$4 sm:$0xff]  }
 0x1aa   :  { %6102 = vst [vmem:[#allocation12_spill] sm:$0xff] %v5508_v58  ;;  %v4209_v38 = vld [vmem:[%s6085_s4 + $0x2e8] ss:$16 sps:$4 sm:$0xff]  }
 0x1ab   :  { %v5510_v4 = vpop.f32.mrb[44].mxu1 }
 0x1ac   :  { %6103 = vst [vmem:[#allocation13_spill] sm:$0xff] %v5510_v4  ;;  %v5512_v32 = vpop.f32.mrb[45].mxu1 }
 0x1ad   :  { %6104 = vst [vmem:[#allocation14_spill] sm:$0xff] %v5512_v32  ;;  %v5514_v55 = vpop.f32.mrb[46].mxu1  ;;  %v4200_v32 = vld [vmem:[%s6085_s4 + $0x288] ss:$16 sps:$4 sm:$0xff]  }
 0x1ae   :  { %6105 = vst [vmem:[#allocation15_spill] sm:$0xff] %v5514_v55  ;;  %v5516_v59 = vpop.f32.mrb[47].mxu1 }
 0x1af   :  { %6106 = vst [vmem:[#allocation16_spill] sm:$0xff] %v5516_v59 }
 0x1b0   :  { %2423 = vmatmul.mubr.bf16.gmra.mrb[88].mxu1 %v4106_v29  ;;  %2584 = vmatmul.mubr.bf16.gmra.mrb[72].mxu0 %v4107_v2  ;;  %v4130_v29 = vld [vmem:[%s6085_s4 + $0x1c0] ss:$16 sps:$4 sm:$0xff]   ;;  %v4131_v2 = vld [vmem:[%s6085_s4 + $0xc8] ss:$16 sps:$4 sm:$0xff]  }
 0x1b1   :  { %2430 = vmatprep.mubr.bf16.mxu1 %v4108_v53  ;;  %2591 = vmatprep.mubr.bf16.mxu0 %v4110_v26  ;;  %v4132_v53 = vld [vmem:[%s6085_s4 + $0x1e4] ss:$16 sps:$4 sm:$0xff]   ;;  %v4134_v26 = vld [vmem:[%s6085_s4 + $0xec] ss:$16 sps:$4 sm:$0xff]  }
 0x1b8   :  { %2431 = vmatmul.mubr.bf16.gmra.mrb[92].mxu1 %v4112_v6  ;;  %2592 = vmatmul.mubr.bf16.gmra.mrb[76].mxu0 %v4113_v7  ;;  %v4136_v6 = vld [vmem:[%s6085_s4 + $0x1e0] ss:$16 sps:$4 sm:$0xff]   ;;  %v4137_v7 = vld [vmem:[%s6085_s4 + $0xe8] ss:$16 sps:$4 sm:$0xff]  }
 0x1b9   :  { %2438 = vmatprep.mubr.bf16.mxu1 %v4114_v16  ;;  %2599 = vmatprep.mubr.bf16.mxu0 %v4116_v61  ;;  %v4138_v16 = vld [vmem:[%s6085_s4 + $0x204] ss:$16 sps:$4 sm:$0xff]   ;;  %v4140_v61 = vld [vmem:[%s6085_s4 + $0x10c] ss:$16 sps:$4 sm:$0xff]  }
 0x1c0   :  { %2439 = vmatmul.mubr.bf16.gmra.mrb[96].mxu1 %v4118_v25  ;;  %2600 = vmatmul.mubr.bf16.gmra.mrb[80].mxu0 %v4119_v21  ;;  %v4142_v25 = vld [vmem:[%s6085_s4 + $0x200] ss:$16 sps:$4 sm:$0xff]   ;;  %v4143_v21 = vld [vmem:[%s6085_s4 + $0x108] ss:$16 sps:$4 sm:$0xff]  }
 0x1c1   :  { %2446 = vmatprep.mubr.bf16.mxu1 %v4120_v3  ;;  %2607 = vmatprep.mubr.bf16.mxu0 %v4122_v33  ;;  %v4144_v3 = vld [vmem:[%s6085_s4 + $0x224] ss:$16 sps:$4 sm:$0xff]   ;;  %v4146_v33 = vld [vmem:[%s6085_s4 + $0x12c] ss:$16 sps:$4 sm:$0xff]  }
 0x1c8   :  { %2447 = vmatmul.mubr.bf16.gmra.mrb[100].mxu1 %v4124_v9  ;;  %2608 = vmatmul.mubr.bf16.gmra.mrb[84].mxu0 %v4125_v49  ;;  %v4148_v9 = vld [vmem:[%s6085_s4 + $0x220] ss:$16 sps:$4 sm:$0xff]   ;;  %v4149_v49 = vld [vmem:[%s6085_s4 + $0x128] ss:$16 sps:$4 sm:$0xff]  }
 0x1c9   :  { %2454 = vmatprep.mubr.bf16.mxu1 %v4126_v8  ;;  %2615 = vmatprep.mubr.bf16.mxu0 %v4128_v50  ;;  %v4150_v8 = vld [vmem:[%s6085_s4 + $0x244] ss:$16 sps:$4 sm:$0xff]   ;;  %v4152_v50 = vld [vmem:[%s6085_s4 + $0x14c] ss:$16 sps:$4 sm:$0xff]  }
 0x1d0   :  { %2455 = vmatmul.mubr.bf16.gmra.mrb[104].mxu1 %v4130_v29  ;;  %2616 = vmatmul.mubr.bf16.gmra.mrb[88].mxu0 %v4131_v2  ;;  %v4154_v29 = vld [vmem:[%s6085_s4 + $0x240] ss:$16 sps:$4 sm:$0xff]   ;;  %v4155_v2 = vld [vmem:[%s6085_s4 + $0x148] ss:$16 sps:$4 sm:$0xff]  }
 0x1d1   :  { %2462 = vmatprep.mubr.bf16.mxu1 %v4132_v53  ;;  %2623 = vmatprep.mubr.bf16.mxu0 %v4134_v26  ;;  %v4156_v53 = vld [vmem:[%s6085_s4 + $0x264] ss:$16 sps:$4 sm:$0xff]   ;;  %v4158_v26 = vld [vmem:[%s6085_s4 + $0x16c] ss:$16 sps:$4 sm:$0xff]  }
 0x1d8   :  { %2463 = vmatmul.mubr.bf16.gmra.mrb[108].mxu1 %v4136_v6  ;;  %2624 = vmatmul.mubr.bf16.gmra.mrb[92].mxu0 %v4137_v7  ;;  %v4160_v6 = vld [vmem:[%s6085_s4 + $0x260] ss:$16 sps:$4 sm:$0xff]   ;;  %v4161_v7 = vld [vmem:[%s6085_s4 + $0x168] ss:$16 sps:$4 sm:$0xff]  }
 0x1d9   :  { %2470 = vmatprep.mubr.bf16.mxu1 %v4138_v16  ;;  %2631 = vmatprep.mubr.bf16.mxu0 %v4140_v61  ;;  %v4162_v16 = vld [vmem:[%s6085_s4 + $0x284] ss:$16 sps:$4 sm:$0xff]   ;;  %v4164_v61 = vld [vmem:[%s6085_s4 + $0x18c] ss:$16 sps:$4 sm:$0xff]  }
 0x1e0   :  { %2471 = vmatmul.mubr.bf16.gmra.mrb[112].mxu1 %v4142_v25  ;;  %2632 = vmatmul.mubr.bf16.gmra.mrb[96].mxu0 %v4143_v21  ;;  %v4166_v25 = vld [vmem:[%s6085_s4 + $0x280] ss:$16 sps:$4 sm:$0xff]   ;;  %v4167_v21 = vld [vmem:[%s6085_s4 + $0x188] ss:$16 sps:$4 sm:$0xff]  }
 0x1e1   :  { %2478 = vmatprep.mubr.bf16.mxu1 %v4144_v3  ;;  %2639 = vmatprep.mubr.bf16.mxu0 %v4146_v33  ;;  %v4168_v3 = vld [vmem:[%s6085_s4 + $0x2a4] ss:$16 sps:$4 sm:$0xff]   ;;  %v4170_v33 = vld [vmem:[%s6085_s4 + $0x1ac] ss:$16 sps:$4 sm:$0xff]  }
 0x1e8   :  { %2479 = vmatmul.mubr.bf16.gmra.mrb[116].mxu1 %v4148_v9  ;;  %2640 = vmatmul.mubr.bf16.gmra.mrb[100].mxu0 %v4149_v49  ;;  %v4172_v9 = vld [vmem:[%s6085_s4 + $0x2a0] ss:$16 sps:$4 sm:$0xff]   ;;  %v4173_v49 = vld [vmem:[%s6085_s4 + $0x1a8] ss:$16 sps:$4 sm:$0xff]  }
 0x1e9   :  { %2486 = vmatprep.mubr.bf16.mxu1 %v4150_v8  ;;  %2647 = vmatprep.mubr.bf16.mxu0 %v4152_v50  ;;  %v4174_v8 = vld [vmem:[%s6085_s4 + $0x2c4] ss:$16 sps:$4 sm:$0xff]   ;;  %v4176_v50 = vld [vmem:[%s6085_s4 + $0x1cc] ss:$16 sps:$4 sm:$0xff]  }
 0x1f0   :  { %2487 = vmatmul.mubr.bf16.gmra.mrb[120].mxu1 %v4154_v29  ;;  %2648 = vmatmul.mubr.bf16.gmra.mrb[104].mxu0 %v4155_v2  ;;  %v4178_v29 = vld [vmem:[%s6085_s4 + $0x2c0] ss:$16 sps:$4 sm:$0xff]   ;;  %v4179_v2 = vld [vmem:[%s6085_s4 + $0x1c8] ss:$16 sps:$4 sm:$0xff]  }
 0x1f1   :  { %2494 = vmatprep.mubr.bf16.mxu1 %v4156_v53  ;;  %2655 = vmatprep.mubr.bf16.mxu0 %v4158_v26  ;;  %v4180_v53 = vld [vmem:[%s6085_s4 + $0x2e4] ss:$16 sps:$4 sm:$0xff]   ;;  %v4182_v26 = vld [vmem:[%s6085_s4 + $0x1ec] ss:$16 sps:$4 sm:$0xff]  }
 0x1f8   :  { %2495 = vmatmul.mubr.bf16.gmra.mrb[124].mxu1 %v4160_v6  ;;  %2656 = vmatmul.mubr.bf16.gmra.mrb[108].mxu0 %v4161_v7  ;;  %v4184_v6 = vld [vmem:[%s6085_s4 + $0x2e0] ss:$16 sps:$4 sm:$0xff]   ;;  %v4185_v7 = vld [vmem:[%s6085_s4 + $0x1e8] ss:$16 sps:$4 sm:$0xff]  }
 0x1f9   :  { %2502 = vmatprep.mubr.bf16.mxu1 %v4162_v16  ;;  %2663 = vmatprep.mubr.bf16.mxu0 %v4164_v61  ;;  %v4186_v16 = vld [vmem:[%s6085_s4 + $0x20c] ss:$16 sps:$4 sm:$0xff]   ;;  %v4188_v61 = vld [vmem:[%s6085_s4 + $0x208] ss:$16 sps:$4 sm:$0xff]  }
 0x200   :  { %2503 = vmatmul.mubr.bf16.gmra.mrb[128].mxu1 %v4166_v25  ;;  %2664 = vmatmul.mubr.bf16.gmra.mrb[112].mxu0 %v4167_v21  ;;  %v4189_v25 = vld [vmem:[%s6085_s4 + $0x22c] ss:$16 sps:$4 sm:$0xff]   ;;  %v5677_v21 = vpop.permute.xlu0 %2890 }
 0x201   :  { %2510 = vmatprep.mubr.bf16.mxu1 %v4168_v3  ;;  %2671 = vmatprep.mubr.bf16.mxu0 %v4170_v33  ;;  %v5679_v3 = vpop.permute.xlu1 %2895 }
 0x204   :  { %v5681_v33 = vpop.permute.xlu0 %2810 }
 0x208   :  { %2511 = vmatmul.mubr.bf16.gmra.mrb[132].mxu1 %v4172_v9  ;;  %2672 = vmatmul.mubr.bf16.gmra.mrb[116].mxu0 %v4173_v49  ;;  %v4191_v9 = vld [vmem:[%s6085_s4 + $0x228] ss:$16 sps:$4 sm:$0xff]   ;;  %v4192_v49 = vld [vmem:[%s6085_s4 + $0x24c] ss:$16 sps:$4 sm:$0xff]  }
 0x209   :  { %2518 = vmatprep.mubr.bf16.mxu1 %v4174_v8  ;;  %2679 = vmatprep.mubr.bf16.mxu0 %v4176_v50  ;;  %v5689_v8 = vpop.permute.xlu1 %2815  ;;  %v5691_v50 = vpop.permute.xlu0 %2900 }
 0x210   :  { %2519 = vmatmul.mubr.bf16.gmra.mrb[136].mxu1 %v4178_v29  ;;  %2680 = vmatmul.mubr.bf16.gmra.mrb[120].mxu0 %v4179_v2  ;;  %v4194_v29 = vld [vmem:[%s6085_s4 + $0x248] ss:$16 sps:$4 sm:$0xff]   ;;  %v4195_v2 = vld [vmem:[%s6085_s4 + $0x26c] ss:$16 sps:$4 sm:$0xff]  }
 0x211   :  { %2526 = vmatprep.mubr.bf16.mxu1 %v4180_v53  ;;  %2687 = vmatprep.mubr.bf16.mxu0 %v4182_v26  ;;  %v5699_v53 = vpop.permute.xlu1 %2905  ;;  %v5701_v26 = vpop.permute.xlu0 %2820 }
 0x215   :  { %v5714_v55 = vpop.permute.xlu0 %2970 }
 0x216   :  { %6107 = vst [vmem:[#allocation17_spill] sm:$0xff] %v5714_v55 }
 0x218   :  { %2527 = vmatmul.mubr.bf16.gmra.mrb[140].mxu1 %v4184_v6  ;;  %2688 = vmatmul.mubr.bf16.gmra.mrb[124].mxu0 %v4185_v7 }
 0x219   :  { %2695 = vmatprep.mubr.bf16.mxu0 %v4186_v16 }
 0x220   :  { %2696 = vmatmul.mubr.bf16.gmra.mrb[128].mxu0 %v4188_v61  ;;  %v4197_v61 = vld [vmem:[%s6085_s4 + $0x268] ss:$16 sps:$4 sm:$0xff]  }
 0x221   :  { %2703 = vmatprep.mubr.bf16.mxu0 %v4189_v25  ;;  %v5709_v25 = vpop.permute.xlu1 %2825 }
 0x228   :  { %2704 = vmatmul.mubr.bf16.gmra.mrb[132].mxu0 %v4191_v9 }
 0x229   :  { %2711 = vmatprep.mubr.bf16.mxu0 %v4192_v49  ;;  %v4198_v49 = vld [vmem:[%s6085_s4 + $0x28c] ss:$16 sps:$4 sm:$0xff]  }
 0x230   :  { %2712 = vmatmul.mubr.bf16.gmra.mrb[136].mxu0 %v4194_v29 }
 0x231   :  { %2719 = vmatprep.mubr.bf16.mxu0 %v4195_v2 }
 0x233   :  { %v2344_v6 = vpop.f32.mrb[48].mxu1 }
 0x234   :  { %v5704_v7 = vadd.f32 %v2344_v6, %v5353_v34  ;;  %v2346_v16 = vpop.f32.mrb[49].mxu1  ;;  %v5719_v34 = vpop.permute.xlu1 %2975 }
 0x235   :  { %v2347_v9 = vpop.f32.mrb[50].mxu1  ;;  %6108 = vst [vmem:[#allocation18_spill] sm:$0xff] %v5719_v34  ;;  %v5721_v16 = vpop.permute.xlu0 %2910  ;;  %v4203_v34 = vld [vmem:[%s6085_s4 + $0x2a8] ss:$16 sps:$4 sm:$0xff]  }
 0x236   :  { %v5717_v29 = vadd.f32 %v2347_v9, %v5360_v10  ;;  %v2349_v2 = vpop.f32.mrb[51].mxu1  ;;  %6109 = vst [vmem:[#allocation19_spill] sm:$0xff] %v5721_v16  ;;  %v4201_v10 = vld [vmem:[%s6085_s4 + $0x2ac] ss:$16 sps:$4 sm:$0xff]  }
 0x238   :  { %2720 = vmatmul.mubr.bf16.gmra.mrb[140].mxu0 %v4197_v61 }
 0x239   :  { %2727 = vmatprep.mubr.bf16.mxu0 %v4198_v49  ;;  %v5735_v49 = vpop.permute.xlu1 %2915 }
 0x23a   :  { %6110 = vst [vmem:[#allocation20_spill] sm:$0xff] %v5735_v49 }
 0x23b   :  { %v2352_v6 = vpop.f32.mrb[52].mxu1 }
 0x23c   :  { %v5724_v4 = vadd.f32 %v5351_v54, %v2352_v6  ;;  %v2354_v59 = vpop.f32.mrb[53].mxu1  ;;  %v5737_v54 = vpop.permute.xlu0 %2830 }
 0x23d   :  { %v2355_v55 = vpop.f32.mrb[54].mxu1 }
 0x23e   :  { %v5733_v61 = vadd.f32 %v5357_v57, %v2355_v55  ;;  %v2357_v9 = vpop.f32.mrb[55].mxu1  ;;  %v4204_v57 = vld [vmem:[%s6085_s4 + $0x2cc] ss:$16 sps:$4 sm:$0xff]  }
 0x240   :  { %2728 = vmatmul.mubr.bf16.gmra.mrb[144].mxu0 %v4200_v32  ;;  %v5753_v9 = vpop.permute.xlu0 %2980 }
 0x241   :  { %2735 = vmatprep.mubr.bf16.mxu0 %v4201_v10  ;;  %v5751_v10 = vpop.permute.xlu1 %2835  ;;  %6111 = vst [vmem:[#allocation21_spill] sm:$0xff] %v5753_v9 }
 0x243   :  { %v2360_v59 = vpop.f32.mrb[56].mxu1 }
 0x244   :  { %v5740_v2 = vadd.f32 %v2360_v59, %v5370_v15  ;;  %v2362_v6 = vpop.f32.mrb[57].mxu1 }
 0x245   :  { %v2363_v56 = vpop.f32.mrb[58].mxu1  ;;  %v5761_v58 = vpop.permute.xlu1 %2985 }
 0x246   :  { %v5749_v32 = vadd.f32 %v2363_v56, %v5377_v20  ;;  %v2365_v55 = vpop.f32.mrb[59].mxu1  ;;  %6112 = vst [vmem:[#allocation22_spill] sm:$0xff] %v5761_v58  ;;  %v4207_v56 = vld [vmem:[%s6085_s4 + $0x2ec] ss:$16 sps:$4 sm:$0xff]  }
 0x247   :  { %v5766_v55 = vpop.permute.xlu0 %2920 }
 0x248   :  { %2736 = vmatmul.mubr.bf16.gmra.mrb[148].mxu0 %v4203_v34  ;;  %6113 = vst [vmem:[#allocation23_spill] sm:$0xff] %v5766_v55 }
 0x249   :  { %2743 = vmatprep.mubr.bf16.mxu0 %v4204_v57 }
 0x24b   :  { %v2368_v15 = vpop.f32.mrb[60].mxu1 }
 0x24c   :  { %v5756_v59 = vadd.f32 %v5365_v40, %v2368_v15  ;;  %v2370_v6 = vpop.f32.mrb[61].mxu1  ;;  %v5771_v40 = vpop.permute.xlu1 %2925 }
 0x24d   :  { %v2371_v20 = vpop.f32.mrb[62].mxu1  ;;  %6114 = vst [vmem:[#allocation24_spill] sm:$0xff] %v5771_v40  ;;  %v5773_v6 = vpop.permute.xlu0 %2840 }
 0x24e   :  { %v5769_v34 = vadd.f32 %v5375_v63, %v2371_v20  ;;  %v2373_v57 = vpop.f32.mrb[63].mxu1 }
 0x250   :  { %2744 = vmatmul.mubr.bf16.gmra.mrb[152].mxu0 %v4206_v46  ;;  %v5784_v46 = vpop.permute.xlu1 %2845 }
 0x251   :  { %2751 = vmatprep.mubr.bf16.mxu0 %v4207_v56  ;;  %v5786_v56 = vpop.permute.xlu0 %2990 }
 0x252   :  { %6115 = vst [vmem:[#allocation25_spill] sm:$0xff] %v5786_v56 }
 0x253   :  { %v2376_v15 = vpop.f32.mrb[64].mxu1 }
 0x254   :  { %v5776_v58 = vadd.f32 %v2376_v15, %v5384_v23  ;;  %v2378_v9 = vpop.f32.mrb[65].mxu1  ;;  %v5794_v51 = vpop.permute.xlu1 %2995 }
 0x255   :  { %v2379_v0 = vpop.f32.mrb[66].mxu1  ;;  %6116 = vst [vmem:[#allocation26_spill] sm:$0xff] %v5794_v51 }
 0x256   :  { %v5782_v63 = vadd.f32 %v2379_v0, %v5394_v62  ;;  %v2381_v20 = vpop.f32.mrb[67].mxu1  ;;  %v5796_v62 = vpop.permute.xlu0 %2930 }
 0x257   :  { %6117 = vst [vmem:[#allocation27_spill] sm:$0xff] %v5796_v62 }
 0x258   :  { %2752 = vmatmul.mubr.bf16.gmra.mrb[156].mxu0 %v4209_v38  ;;  %v5801_v56 = vpop.permute.xlu1 %2935 }
 0x259   :  { %6118 = vst [vmem:[#allocation28_spill] sm:$0xff] %v5801_v56 }
 0x25b   :  { %v2384_v57 = vpop.f32.mrb[68].mxu1 }
 0x25c   :  { %v5789_v40 = vadd.f32 %v5381_v13, %v2384_v57  ;;  %v2386_v23 = vpop.f32.mrb[69].mxu1  ;;  %v5803_v13 = vpop.permute.xlu0 %2850 }
 0x25d   :  { %v2387_v9 = vpop.f32.mrb[70].mxu1  ;;  %v5808_v23 = vpop.permute.xlu1 %2855 }
 0x25e   :  { %v5792_v15 = vadd.f32 %v5389_v14, %v2387_v9  ;;  %v2389_v55 = vpop.f32.mrb[71].mxu1 }
 0x260   :  { %v5810_v9 = vpop.permute.xlu0 %3000 }
 0x261   :  { %6119 = vst [vmem:[#allocation29_spill] sm:$0xff] %v5810_v9  ;;  %v5818_v62 = vpop.permute.xlu1 %3005 }
 0x262   :  { %6120 = vst [vmem:[#allocation30_spill] sm:$0xff] %v5818_v62 }
 0x263   :  { %v2392_v0 = vpop.f32.mrb[72].mxu1 }
 0x264   :  { %v5799_v38 = vadd.f32 %v2392_v0, %v5401_v28  ;;  %v2394_v20 = vpop.f32.mrb[73].mxu1  ;;  %v5820_v36 = vpop.permute.xlu0 %2940 }
 0x265   :  { %v2395_v49 = vpop.f32.mrb[74].mxu1  ;;  %6121 = vst [vmem:[#allocation31_spill] sm:$0xff] %v5820_v36 }
 0x266   :  { %v5806_v57 = vadd.f32 %v2395_v49, %v5405_v17  ;;  %v2397_v14 = vpop.f32.mrb[75].mxu1 }
 0x26b   :  { %v2400_v55 = vpop.f32.mrb[76].mxu1 }
 0x26c   :  { %v5813_v51 = vadd.f32 %v5398_v43, %v2400_v55  ;;  %v2402_v28 = vpop.f32.mrb[77].mxu1 }
 0x26d   :  { %v2403_v0 = vpop.f32.mrb[78].mxu1 }
 0x26e   :  { %v5816_v20 = vadd.f32 %v5403_v30, %v2403_v0  ;;  %v2405_v56 = vpop.f32.mrb[79].mxu1 }
 0x273   :  { %v2408_v17 = vpop.f32.mrb[80].mxu1  ;;  %v2569_v49 = vpop.f32.mrb[64].mxu0 }
 0x274   :  { %v5823_v14 = vadd.f32 %v2408_v17, %v5412_v52  ;;  %v2570_v9 = vadd.f32 %v2569_v49, %v5704_v7  ;;  %v2410_v16 = vpop.f32.mrb[81].mxu1  ;;  %v2571_v43 = vpop.f32.mrb[65].mxu0  ;;  %v3145_v52 = vld [vmem:[%s6088_s7 + $0x8] sm:$0xff] }
 0x275   :  { %v2411_v55 = vpop.f32.mrb[82].mxu1  ;;  %v2572_v28 = vpop.f32.mrb[66].mxu0  ;;  %3217 = vmatprep.mubr.f32.mxu1 %v3145_v52 }
 0x276   :  { %v3048_v47 = vadd.f32 %v5681_v33, %v2570_v9  ;;  %v5828_v30 = vadd.f32 %v2411_v55, %v5422_v5  ;;  %v2573_v56 = vadd.f32 %v2572_v28, %v5717_v29  ;;  %v2574_v0 = vpop.f32.mrb[67].mxu0  ;;  %v2413_v62 = vpop.f32.mrb[83].mxu1 }
 0x277   :  { %v5835_v7 = vpop.permute.xlu1 %2945  ;;  %v5837_v16 = vpop.permute.xlu0 %2860 }
 0x278   :  { %v3049_v36 = vadd.f32 %v5689_v8, %v2573_v56  ;;  %v3096_v17 = vmax.f32 %v3048_v47, 0.0  ;;  %v6091_v56 = vmov 0.0|0.0  }
 0x279   :  { %4003 = vmatprep.subr.bf16.mxu0 %v6091_v56 }
 0x27a   :  { %v3097_v33 = vmax.f32 %v3049_v36, 0.0 }
 0x27b   :  { %v2416_v9 = vpop.f32.mrb[84].mxu1  ;;  %v2577_v5 = vpop.f32.mrb[68].mxu0 }
 0x27c   :  { %v5839_v49 = vpack.c.bf16 %v3097_v33, %v3096_v17  ;;  %v5842_v29 = vadd.f32 %v5409_v48, %v2416_v9  ;;  %v2578_v8 = vadd.f32 %v2577_v5, %v5724_v4  ;;  %v2418_v62 = vpop.f32.mrb[85].mxu1  ;;  %v2579_v43 = vpop.f32.mrb[69].mxu0 }
 0x27d   :  { %v2419_v55 = vpop.f32.mrb[86].mxu1  ;;  %v2580_v28 = vpop.f32.mrb[70].mxu0 }
 0x27e   :  { %v3050_v0 = vadd.f32 %v5701_v26, %v2578_v8  ;;  %v5848_v47 = vadd.f32 %v5417_v1, %v2419_v55  ;;  %v2581_v36 = vadd.f32 %v2580_v28, %v5733_v61  ;;  %v2582_v52 = vpop.f32.mrb[71].mxu0  ;;  %v2421_v17 = vpop.f32.mrb[87].mxu1 }
 0x27f   :  { %v5852_v33 = vpop.permute.xlu1 %2865  ;;  %v5854_v4 = vpop.permute.xlu0 %3010 }
 0x280   :  { %v3051_v48 = vadd.f32 %v5709_v25, %v2581_v36  ;;  %v3098_v9 = vmax.f32 %v3050_v0, 0.0 }
 0x282   :  { %v3099_v5 = vmax.f32 %v3051_v48, 0.0 }
 0x283   :  { %v2424_v62 = vpop.f32.mrb[88].mxu1  ;;  %v2585_v43 = vpop.f32.mrb[72].mxu0 }
 0x284   :  { %v5856_v56 = vpack.c.bf16 %v3099_v5, %v3098_v9  ;;  %v5859_v26 = vadd.f32 %v2424_v62, %v5427_v60  ;;  %v2586_v1 = vadd.f32 %v2585_v43, %v5740_v2  ;;  %v2426_v61 = vpop.f32.mrb[89].mxu1  ;;  %v2587_v8 = vpop.f32.mrb[73].mxu0 }
 0x285   :  { %v2427_v55 = vpop.f32.mrb[90].mxu1  ;;  %v2588_v28 = vpop.f32.mrb[74].mxu0 }
 0x286   :  { %v3052_v25 = vadd.f32 %v5737_v54, %v2586_v1  ;;  %v5864_v36 = vadd.f32 %v2427_v55, %v5431_v22  ;;  %v2589_v0 = vadd.f32 %v2588_v28, %v5749_v32  ;;  %v2590_v52 = vpop.f32.mrb[75].mxu0  ;;  %v2429_v17 = vpop.f32.mrb[91].mxu1 }
 0x287   :  { %v5868_v9 = vpop.permute.xlu1 %3015  ;;  %v5870_v60 = vpop.permute.xlu0 %2950 }
 0x288   :  { %v3053_v48 = vadd.f32 %v5751_v10, %v2589_v0  ;;  %v3100_v2 = vmax.f32 %v3052_v25, 0.0 }
 0x28a   :  { %v3101_v5 = vmax.f32 %v3053_v48, 0.0 }
 0x28b   :  { %v2432_v62 = vpop.f32.mrb[92].mxu1  ;;  %v2593_v43 = vpop.f32.mrb[76].mxu0 }
 0x28c   :  { %v5872_v61 = vpack.c.bf16 %v3101_v5, %v3100_v2  ;;  %v5875_v54 = vadd.f32 %v5425_v45, %v2432_v62  ;;  %v2594_v22 = vadd.f32 %v2593_v43, %v5756_v59  ;;  %v2434_v32 = vpop.f32.mrb[93].mxu1  ;;  %v2595_v1 = vpop.f32.mrb[77].mxu0 }
 0x28d   :  { %v2435_v8 = vpop.f32.mrb[94].mxu1  ;;  %v2596_v55 = vpop.f32.mrb[78].mxu0 }
 0x28e   :  { %v3054_v10 = vadd.f32 %v5773_v6, %v2594_v22  ;;  %v5880_v28 = vadd.f32 %v5429_v12, %v2435_v8  ;;  %v2597_v25 = vadd.f32 %v2596_v55, %v5769_v34  ;;  %v2598_v0 = vpop.f32.mrb[79].mxu0  ;;  %v2437_v52 = vpop.f32.mrb[95].mxu1 }
 0x28f   :  { %v5884_v48 = vpop.permute.xlu1 %2955  ;;  %v2871_v45 = vpop.permute.xlu0 %2870 }
 0x290   :  { %v3055_v17 = vadd.f32 %v5784_v46, %v2597_v25  ;;  %v3102_v2 = vmax.f32 %v3054_v10, 0.0 }
 0x292   :  { %v3103_v59 = vmax.f32 %v3055_v17, 0.0 }
 0x293   :  { %v2440_v5 = vpop.f32.mrb[96].mxu1  ;;  %v2601_v62 = vpop.f32.mrb[80].mxu0 }
 0x294   :  { %v5886_v43 = vpack.c.bf16 %v3103_v59, %v3102_v2  ;;  %v5889_v6 = vadd.f32 %v2440_v5, %v5436_v41  ;;  %v2602_v12 = vadd.f32 %v2601_v62, %v5776_v58  ;;  %v2442_v22 = vpop.f32.mrb[97].mxu1  ;;  %v2603_v34 = vpop.f32.mrb[81].mxu0 }
 0x295   :  { %v2443_v32 = vpop.f32.mrb[98].mxu1  ;;  %v2604_v1 = vpop.f32.mrb[82].mxu0 }
 0x296   :  { %v3056_v46 = vadd.f32 %v5803_v13, %v2602_v12  ;;  %v5894_v8 = vadd.f32 %v2443_v32, %v5452_v11  ;;  %v2605_v55 = vadd.f32 %v2604_v1, %v5782_v63  ;;  %v2606_v10 = vpop.f32.mrb[83].mxu0  ;;  %v2445_v25 = vpop.f32.mrb[99].mxu1 }
 0x297   :  { %v2876_v52 = vpop.permute.xlu1 %2875  ;;  %v5898_v41 = vpop.permute.xlu0 %3020 }
 0x298   :  { %v3057_v0 = vadd.f32 %v5808_v23, %v2605_v55  ;;  %v3104_v17 = vmax.f32 %v3056_v46, 0.0 }
 0x29a   :  { %v3105_v58 = vmax.f32 %v3057_v0, 0.0 }
 0x29b   :  { %v2448_v2 = vpop.f32.mrb[100].mxu1  ;;  %v2609_v59 = vpop.f32.mrb[84].mxu0 }
 0x29c   :  { %v5900_v5 = vpack.c.bf16 %v3105_v58, %v3104_v17  ;;  %v5903_v13 = vadd.f32 %v5434_v24, %v2448_v2  ;;  %v2610_v11 = vadd.f32 %v2609_v59, %v5789_v40  ;;  %v2450_v62 = vpop.f32.mrb[101].mxu1  ;;  %v2611_v63 = vpop.f32.mrb[85].mxu0 }
 0x29d   :  { %v2451_v12 = vpop.f32.mrb[102].mxu1  ;;  %v2612_v22 = vpop.f32.mrb[86].mxu0 }
 0x29e   :  { %v3058_v23 = vadd.f32 %v5837_v16, %v2610_v11  ;;  %v5908_v34 = vadd.f32 %v5444_v44, %v2451_v12  ;;  %v2613_v32 = vadd.f32 %v2612_v22, %v5792_v15  ;;  %v2614_v1 = vpop.f32.mrb[87].mxu0  ;;  %v2453_v46 = vpop.f32.mrb[103].mxu1 }
 0x29f   :  { %v5912_v10 = vpop.permute.xlu1 %3025  ;;  %v5914_v24 = vpop.permute.xlu0 %2960 }
 0x2a0   :  { %v3059_v55 = vadd.f32 %v5852_v33, %v2613_v32  ;;  %v3106_v40 = vmax.f32 %v3058_v23, 0.0 }
 0x2a2   :  { %v3107_v25 = vmax.f32 %v3059_v55, 0.0 }
 0x2a3   :  { %v2456_v0 = vpop.f32.mrb[104].mxu1  ;;  %v2617_v17 = vpop.f32.mrb[88].mxu0 }
 0x2a4   :  { %v5916_v58 = vpack.c.bf16 %v3107_v25, %v3106_v40  ;;  %v5919_v16 = vadd.f32 %v2456_v0, %v5456_v19  ;;  %v2618_v44 = vadd.f32 %v2617_v17, %v5799_v38  ;;  %v2458_v15 = vpop.f32.mrb[105].mxu1  ;;  %v2619_v2 = vpop.f32.mrb[89].mxu0 }
 0x2a5   :  { %v2459_v59 = vpop.f32.mrb[106].mxu1  ;;  %v2620_v11 = vpop.f32.mrb[90].mxu0 }
 0x2a6   :  { %v3060_v33 = vadd.f32 %v2871_v45, %v2618_v44  ;;  %v5923_v62 = vadd.f32 %v2459_v59, %v5460_v39  ;;  %v2621_v63 = vadd.f32 %v2620_v11, %v5806_v57  ;;  %v2622_v12 = vpop.f32.mrb[91].mxu0  ;;  %v2461_v22 = vpop.f32.mrb[107].mxu1 }
 0x2a7   :  { %v5926_v32 = vpop.permute.xlu1 %2965  ;;  %v2881_v1 = vpop.permute.xlu0 %2880 }
 0x2a8   :  { %v3061_v23 = vadd.f32 %v2876_v52, %v2621_v63  ;;  %v3108_v19 = vmax.f32 %v3060_v33, 0.0 }
 0x2aa   :  { %v3109_v46 = vmax.f32 %v3061_v23, 0.0 }
 0x2ab   :  { %v2464_v55 = vpop.f32.mrb[108].mxu1  ;;  %v2625_v38 = vpop.f32.mrb[92].mxu0 }
 0x2ac   :  { %v5928_v40 = vpack.c.bf16 %v3109_v46, %v3108_v19  ;;  %v5931_v25 = vadd.f32 %v5454_v37, %v2464_v55  ;;  %v2626_v39 = vadd.f32 %v2625_v38, %v5813_v51  ;;  %v2466_v45 = vpop.f32.mrb[109].mxu1  ;;  %v2627_v0 = vpop.f32.mrb[93].mxu0 }
 0x2ad   :  { %v2467_v57 = vpop.f32.mrb[110].mxu1  ;;  %v2628_v17 = vpop.f32.mrb[94].mxu0 }
 0x2ae   :  { %v3062_v44 = vadd.f32 %v2881_v1, %v2626_v39  ;;  %v5935_v52 = vadd.f32 %v5458_v18, %v2467_v57  ;;  %v2629_v15 = vadd.f32 %v2628_v17, %v5816_v20  ;;  %v2630_v2 = vpop.f32.mrb[95].mxu0  ;;  %v2469_v59 = vpop.f32.mrb[111].mxu1 }
 0x2af   :  { %v2886_v11 = vpop.permute.xlu1 %2885 }
 0x2b0   :  { %v3063_v33 = vadd.f32 %v2886_v11, %v2629_v15  ;;  %v3110_v63 = vmax.f32 %v3062_v44, 0.0 }
 0x2b2   :  { %v3111_v12 = vmax.f32 %v3063_v33, 0.0 }
 0x2b3   :  { %v2472_v37 = vpop.f32.mrb[112].mxu1  ;;  %v2633_v22 = vpop.f32.mrb[96].mxu0 }
 0x2b4   :  { %v5938_v23 = vpack.c.bf16 %v3111_v12, %v3110_v63  ;;  %v5941_v51 = vadd.f32 %v2472_v37, %v5464_v42  ;;  %v2634_v1 = vadd.f32 %v2633_v22, %v5823_v14  ;;  %v2474_v19 = vpop.f32.mrb[113].mxu1  ;;  %v2635_v18 = vpop.f32.mrb[97].mxu0  ;;  %v4237_v42 = vmov 0.0  }
 0x2b5   :  { %v2475_v46 = vpop.f32.mrb[114].mxu1  ;;  %v2636_v55 = vpop.f32.mrb[98].mxu0  ;;  %3920 = vmatprep.mubr.msk.f32.mxu0 %vm4236_vm3, %v4237_v42  ;;  %v6124_v42 = vld [vmem:[#allocation8_spill] sm:$0xff] }
 0x2b6   :  { %v3064_v20 = vadd.f32 %v5677_v21, %v2634_v1  ;;  %v5946_v38 = vadd.f32 %v2475_v46, %v5480_v35  ;;  %v2637_v39 = vadd.f32 %v2636_v55, %v5828_v30  ;;  %v2638_v45 = vpop.f32.mrb[99].mxu0  ;;  %v2477_v0 = vpop.f32.mrb[115].mxu1  ;;  %v6122_v46 = vld [vmem:[#allocation6_spill] sm:$0xff] }
 0x2b7   :  { %v6123_v0 = vld [vmem:[#allocation19_spill] sm:$0xff] }
 0x2b8   :  { %v3065_v57 = vadd.f32 %v5679_v3, %v2637_v39  ;;  %v3112_v17 = vmax.f32 %v3064_v20, 0.0 }
 0x2ba   :  { %v3113_v14 = vmax.f32 %v3065_v57, 0.0 }
 0x2bb   :  { %v2480_v44 = vpop.f32.mrb[116].mxu1  ;;  %v2641_v15 = vpop.f32.mrb[100].mxu0 }
 0x2bc   :  { %v5951_v2 = vadd.f32 %v5462_v27, %v2480_v44  ;;  %v2642_v21 = vadd.f32 %v2641_v15, %v5842_v29  ;;  %v2482_v35 = vpop.f32.mrb[117].mxu1  ;;  %v2643_v59 = vpop.f32.mrb[101].mxu0  ;;  %v3971_v11 = vpack.c.bf16 %v3113_v14, %v3112_v17  ;;  %v6125_v44 = vld [vmem:[#allocation20_spill] sm:$0xff] }
 0x2bd   :  { %v2483_v30 = vpop.f32.mrb[118].mxu1  ;;  %v2644_v33 = vpop.f32.mrb[102].mxu0 }
 0x2be   :  { %v3066_v63 = vadd.f32 %v5691_v50, %v2642_v21  ;;  %v5956_v3 = vadd.f32 %v5472_v31, %v2483_v30  ;;  %v2645_v12 = vadd.f32 %v2644_v33, %v5848_v47  ;;  %v2646_v37 = vpop.f32.mrb[103].mxu0  ;;  %3972 = vmatprep.subr.bf16.mxu1 %v3971_v11  ;;  %v2485_v22 = vpop.f32.mrb[119].mxu1  ;;  %v6126_v11 = vld [vmem:[#allocation5_spill] sm:$0xff] }
 0x2bf   :  { %3974 = vmatpush3.bf16.msra.mxu1 %v5839_v49 }
 0x2c0   :  { %v3067_v27 = vadd.f32 %v5699_v53, %v2645_v12  ;;  %v3114_v29 = vmax.f32 %v3066_v63, 0.0 }
 0x2c2   :  { %v3115_v1 = vmax.f32 %v3067_v27, 0.0  ;;  %v6127_v27 = vld [vmem:[#allocation23_spill] sm:$0xff] }
 0x2c3   :  { %v2488_v19 = vpop.f32.mrb[120].mxu1  ;;  %v2649_v18 = vpop.f32.mrb[104].mxu0 }
 0x2c4   :  { %v5962_v55 = vadd.f32 %v2488_v19, %v6122_v46  ;;  %v2650_v50 = vadd.f32 %v2649_v18, %v5859_v26  ;;  %v2490_v31 = vpop.f32.mrb[121].mxu1  ;;  %v2651_v20 = vpop.f32.mrb[105].mxu0  ;;  %v3975_v39 = vpack.c.bf16 %v3115_v1, %v3114_v29  ;;  %v6128_v1 = vld [vmem:[#allocation7_spill] sm:$0xff] }
 0x2c5   :  { %v2491_v47 = vpop.f32.mrb[122].mxu1  ;;  %v2652_v45 = vpop.f32.mrb[106].mxu0 }
 0x2c6   :  { %v3068_v57 = vadd.f32 %v6123_v0, %v2650_v50  ;;  %v5967_v49 = vadd.f32 %v2491_v47, %v6124_v42  ;;  %v2653_v53 = vadd.f32 %v2652_v45, %v5864_v36  ;;  %v2654_v17 = vpop.f32.mrb[107].mxu0  ;;  %3976 = vmatprep.subr.bf16.mxu1 %v3975_v39  ;;  %v2493_v14 = vpop.f32.mrb[123].mxu1  ;;  %v6129_v50 = vld [vmem:[#allocation24_spill] sm:$0xff]  ;;  %v6130_v45 = vld [vmem:[#allocation10_spill] sm:$0xff] }
 0x2c7   :  { %3978 = vmatpush3.bf16.msra.mxu1 %v5856_v56 }
 0x2c8   :  { %v3069_v15 = vadd.f32 %v6125_v44, %v2653_v53  ;;  %v3116_v26 = vmax.f32 %v3068_v57, 0.0  ;;  %v6131_v44 = vld [vmem:[#allocation27_spill] sm:$0xff] }
 0x2ca   :  { %v3117_v21 = vmax.f32 %v3069_v15, 0.0 }
 0x2cb   :  { %v2496_v35 = vpop.f32.mrb[124].mxu1  ;;  %v2657_v59 = vpop.f32.mrb[108].mxu0 }
 0x2cc   :  { %v5973_v30 = vadd.f32 %v6126_v11, %v2496_v35  ;;  %v2658_v33 = vadd.f32 %v2657_v59, %v5875_v54  ;;  %v2498_v63 = vpop.f32.mrb[125].mxu1  ;;  %v2659_v12 = vpop.f32.mrb[109].mxu0  ;;  %v3979_v37 = vpack.c.bf16 %v3117_v21, %v3116_v26  ;;  %v6132_v26 = vld [vmem:[#allocation12_spill] sm:$0xff] }
 0x2cd   :  { %v2499_v36 = vpop.f32.mrb[126].mxu1  ;;  %v2660_v22 = vpop.f32.mrb[110].mxu0  ;;  %v6133_v11 = vld [vmem:[#allocation28_spill] sm:$0xff] }
 0x2ce   :  { %v3070_v29 = vadd.f32 %v6127_v27, %v2658_v33  ;;  %v5978_v56 = vadd.f32 %v6128_v1, %v2499_v36  ;;  %v2661_v19 = vadd.f32 %v2660_v22, %v5880_v28  ;;  %v2662_v18 = vpop.f32.mrb[111].mxu0  ;;  %3980 = vmatprep.subr.bf16.mxu1 %v3979_v37  ;;  %v2501_v46 = vpop.f32.mrb[127].mxu1  ;;  %v6134_v36 = vld [vmem:[#allocation9_spill] sm:$0xff] }
 0x2cf   :  { %3982 = vmatpush3.bf16.msra.mxu1 %v5872_v61  ;;  %v6135_v46 = vld [vmem:[#allocation31_spill] sm:$0xff] }
 0x2d0   :  { %v3071_v31 = vadd.f32 %v6129_v50, %v2661_v19  ;;  %v3118_v54 = vmax.f32 %v3070_v29, 0.0 }
 0x2d2   :  { %v3119_v20 = vmax.f32 %v3071_v31, 0.0  ;;  %v6136_v31 = vld [vmem:[#allocation11_spill] sm:$0xff] }
 0x2d3   :  { %v2504_v39 = vpop.f32.mrb[128].mxu1  ;;  %v2665_v47 = vpop.f32.mrb[112].mxu0 }
 0x2d4   :  { %v5984_v0 = vadd.f32 %v2504_v39, %v6130_v45  ;;  %v2666_v57 = vadd.f32 %v2665_v47, %v5889_v6  ;;  %v2506_v42 = vpop.f32.mrb[129].mxu1  ;;  %v2667_v53 = vpop.f32.mrb[113].mxu0  ;;  %v3983_v17 = vpack.c.bf16 %v3119_v20, %v3118_v54 }
 0x2d5   :  { %v2507_v28 = vpop.f32.mrb[130].mxu1  ;;  %v2668_v14 = vpop.f32.mrb[114].mxu0  ;;  %v6137_v53 = vld [vmem:[#allocation14_spill] sm:$0xff] }
 0x2d6   :  { %v3072_v15 = vadd.f32 %v6131_v44, %v2666_v57  ;;  %v5989_v61 = vadd.f32 %v2507_v28, %v6132_v26  ;;  %v2669_v21 = vadd.f32 %v2668_v14, %v5894_v8  ;;  %v2670_v35 = vpop.f32.mrb[115].mxu0  ;;  %3984 = vmatprep.subr.bf16.mxu1 %v3983_v17  ;;  %v2509_v59 = vpop.f32.mrb[131].mxu1 }
 0x2d7   :  { %3986 = vmatpush3.bf16.msra.mxu1 %v5886_v43  ;;  %v6138_v35 = vld [vmem:[#allocation16_spill] sm:$0xff] }
 0x2d8   :  { %v3073_v33 = vadd.f32 %v6133_v11, %v2669_v21  ;;  %v3120_v6 = vmax.f32 %v3072_v15, 0.0 }
 0x2da   :  { %v3121_v63 = vmax.f32 %v3073_v33, 0.0 }
 0x2db   :  { %v2512_v12 = vpop.f32.mrb[132].mxu1  ;;  %v2673_v37 = vpop.f32.mrb[116].mxu0 }
 0x2dc   :  { %v5995_v22 = vadd.f32 %v6134_v36, %v2512_v12  ;;  %v2674_v27 = vadd.f32 %v2673_v37, %v5903_v13  ;;  %v2514_v29 = vpop.f32.mrb[133].mxu1  ;;  %v2675_v1 = vpop.f32.mrb[117].mxu0  ;;  %v3987_v19 = vpack.c.bf16 %v3121_v63, %v3120_v6  ;;  %v6139_v37 = vld [vmem:[#allocation13_spill] sm:$0xff] }
 0x2dd   :  { %v2515_v8 = vpop.f32.mrb[134].mxu1  ;;  %v2676_v18 = vpop.f32.mrb[118].mxu0 }
 0x2de   :  { %v3074_v50 = vadd.f32 %v6135_v46, %v2674_v27  ;;  %v6000_v43 = vadd.f32 %v6136_v31, %v2515_v8  ;;  %v2677_v54 = vadd.f32 %v2676_v18, %v5908_v34  ;;  %v2678_v20 = vpop.f32.mrb[119].mxu0  ;;  %3988 = vmatprep.subr.bf16.mxu1 %v3987_v19  ;;  %v2517_v39 = vpop.f32.mrb[135].mxu1  ;;  %v6140_v18 = vld [vmem:[#allocation15_spill] sm:$0xff] }
 0x2df   :  { %3990 = vmatpush3.bf16.msra.mxu1 %v5900_v5 }
 0x2e0   :  { %v3075_v47 = vadd.f32 %v5835_v7, %v2677_v54  ;;  %v3122_v13 = vmax.f32 %v3074_v50, 0.0 }
 0x2e2   :  { %v3123_v45 = vmax.f32 %v3075_v47, 0.0 }
 0x2e3   :  { %v2520_v57 = vpop.f32.mrb[136].mxu1  ;;  %v2681_v42 = vpop.f32.mrb[120].mxu0 }
 0x2e4   :  { %v6006_v17 = vadd.f32 %v2520_v57, %v6137_v53  ;;  %v2682_v28 = vadd.f32 %v2681_v42, %v5919_v16  ;;  %v2522_v14 = vpop.f32.mrb[137].mxu1  ;;  %v2683_v44 = vpop.f32.mrb[121].mxu0  ;;  %v3991_v15 = vpack.c.bf16 %v3123_v45, %v3122_v13  ;;  %v6141_v45 = vld [vmem:[#allocation17_spill] sm:$0xff] }
 0x2e5   :  { %v2523_v34 = vpop.f32.mrb[138].mxu1  ;;  %v2684_v26 = vpop.f32.mrb[122].mxu0 }
 0x2e6   :  { %v3076_v21 = vadd.f32 %v5870_v60, %v2682_v28  ;;  %v6011_v5 = vadd.f32 %v2523_v34, %v6138_v35  ;;  %v2685_v7 = vadd.f32 %v2684_v26, %v5923_v62  ;;  %v2686_v59 = vpop.f32.mrb[123].mxu0  ;;  %3992 = vmatprep.subr.bf16.mxu1 %v3991_v15  ;;  %v2525_v11 = vpop.f32.mrb[139].mxu1 }
 0x2e7   :  { %3994 = vmatpush3.bf16.msra.mxu1 %v5916_v58  ;;  %v6145_v59 = vld [vmem:[#allocation22_spill] sm:$0xff] }
 0x2e8   :  { %v3077_v33 = vadd.f32 %v5884_v48, %v2685_v7  ;;  %v3124_v16 = vmax.f32 %v3076_v21, 0.0  ;;  %v6144_v7 = vmov 0.0|0.0  }
 0x2ea   :  { %v3125_v6 = vmax.f32 %v3077_v33, 0.0 }
 0x2eb   :  { %v2528_v63 = vpop.f32.mrb[140].mxu1  ;;  %v2689_v12 = vpop.f32.mrb[124].mxu0 }
 0x2ec   :  { %v6017_v36 = vadd.f32 %v6139_v37, %v2528_v63  ;;  %v2690_v60 = vadd.f32 %v2689_v12, %v5931_v25  ;;  %v2530_v27 = vpop.f32.mrb[141].mxu1  ;;  %v2691_v29 = vpop.f32.mrb[125].mxu0  ;;  %v3995_v1 = vpack.c.bf16 %v3125_v6, %v3124_v16 }
 0x2ed   :  { %v2531_v62 = vpop.f32.mrb[142].mxu1  ;;  %v2692_v19 = vpop.f32.mrb[126].mxu0 }
 0x2ee   :  { %v3078_v8 = vadd.f32 %v5914_v24, %v2690_v60  ;;  %v6022_v58 = vadd.f32 %v6140_v18, %v2531_v62  ;;  %v2693_v48 = vadd.f32 %v2692_v19, %v5935_v52  ;;  %v2694_v46 = vpop.f32.mrb[127].mxu0  ;;  %3996 = vmatprep.subr.bf16.mxu1 %v3995_v1  ;;  %v2533_v50 = vpop.f32.mrb[143].mxu1  ;;  %v6146_v60 = vld [vmem:[#allocation25_spill] sm:$0xff]  ;;  %v6147_v1 = vld [vmem:[#allocation26_spill] sm:$0xff] }
 0x2ef   :  { %3998 = vmatpush3.bf16.msra.mxu1 %v5928_v40  ;;  %v6142_v40 = vld [vmem:[#allocation18_spill] sm:$0xff] }
 0x2f0   :  { %v3079_v31 = vadd.f32 %v5926_v32, %v2693_v48  ;;  %v3126_v25 = vmax.f32 %v3078_v8, 0.0  ;;  %v3144_v32 = vld [vmem:[%s6088_s7] sm:$0xff] }
 0x2f2   :  { %v3127_v54 = vmax.f32 %v3079_v31, 0.0  ;;  %v6148_v31 = vld [vmem:[#allocation29_spill] sm:$0xff] }
 0x2f3   :  { %v2697_v20 = vpop.f32.mrb[128].mxu0 }
 0x2f4   :  { %v2698_v39 = vadd.f32 %v2697_v20, %v5941_v51  ;;  %v2699_v47 = vpop.f32.mrb[129].mxu0  ;;  %v3999_v13 = vpack.c.bf16 %v3127_v54, %v3126_v25  ;;  %v6149_v20 = vld [vmem:[#allocation30_spill] sm:$0xff] }
 0x2f5   :  { %v2700_v24 = vpop.f32.mrb[130].mxu0 }
 0x2f6   :  { %v3080_v57 = vadd.f32 %v6141_v45, %v2698_v39  ;;  %v2701_v42 = vadd.f32 %v2700_v24, %v5946_v38  ;;  %v2702_v52 = vpop.f32.mrb[131].mxu0  ;;  %4000 = vmatprep.subr.bf16.mxu1 %v3999_v13  ;;  %v6143_v38 = vld [vmem:[#allocation21_spill] sm:$0xff] }
 0x2f7   :  { %4002 = vmatpush3.bf16.msra.mxu1 %v5938_v23 }
 0x2f8   :  { %v3081_v53 = vadd.f32 %v6142_v40, %v2701_v42  ;;  %v3128_v28 = vmax.f32 %v3080_v57, 0.0 }
 0x2fa   :  { %v3129_v14 = vmax.f32 %v3081_v53, 0.0  ;;  %3218 = vmatmul.mubr.f32.vlgmr.msra.gmra.mrb[144].mxu1 %v3144_v32 }
 0x2fb   :  { %v2705_v51 = vpop.f32.mrb[132].mxu0 }
 0x2fc   :  { %v4004_v44 = vpack.c.bf16 %v3129_v14, %v3128_v28  ;;  %v2706_v15 = vadd.f32 %v2705_v51, %v5951_v2  ;;  %v2707_v34 = vpop.f32.mrb[133].mxu0 }
 0x2fd   :  { %v2708_v26 = vpop.f32.mrb[134].mxu0 }
 0x2fe   :  { %v3082_v21 = vadd.f32 %v6143_v38, %v2706_v15  ;;  %v2709_v35 = vadd.f32 %v2708_v26, %v5956_v3  ;;  %4005 = vmatpush3.bf16.msra.mxu0 %v4004_v44  ;;  %v2710_v23 = vpop.f32.mrb[135].mxu0 }
 0x2ff   :  { %4006 = vmatprep.subr.bf16.mxu0 %v6144_v7 }
 0x300   :  { %v3083_v11 = vadd.f32 %v6145_v59, %v2709_v35  ;;  %v3130_v33 = vmax.f32 %v3082_v21, 0.0 }
 0x302   :  { %v3131_v16 = vmax.f32 %v3083_v11, 0.0 }
 0x303   :  { %v2713_v6 = vpop.f32.mrb[136].mxu0 }
 0x304   :  { %v4007_v63 = vpack.c.bf16 %v3131_v16, %v3130_v33  ;;  %v2714_v12 = vadd.f32 %v2713_v6, %v5962_v55  ;;  %v2715_v37 = vpop.f32.mrb[137].mxu0  ;;  %v3036_v16 = vpop.permute.xlu1 %3035 }
 0x305   :  { %v2716_v2 = vpop.f32.mrb[138].mxu0 }
 0x306   :  { %v3084_v27 = vadd.f32 %v6146_v60, %v2714_v12  ;;  %v2717_v29 = vadd.f32 %v2716_v2, %v5967_v49  ;;  %4008 = vmatpush3.bf16.msra.mxu0 %v4007_v63  ;;  %v2718_v3 = vpop.f32.mrb[139].mxu0 }
 0x307   :  { %4009 = vmatprep.subr.bf16.mxu0 %v6144_v7 }
 0x308   :  { %v3085_v62 = vadd.f32 %v6147_v1, %v2717_v29  ;;  %v3132_v19 = vmax.f32 %v3084_v27, 0.0  ;;  %v3046_v1 = vpop.permute.xlu1 %3045 }
 0x30a   :  { %v3133_v8 = vmax.f32 %v3085_v62, 0.0 }
 0x30b   :  { %v2721_v18 = vpop.f32.mrb[140].mxu0 }
 0x30c   :  { %v4010_v48 = vpack.c.bf16 %v3133_v8, %v3132_v19  ;;  %v2722_v46 = vadd.f32 %v2721_v18, %v5973_v30  ;;  %v2723_v50 = vpop.f32.mrb[141].mxu0 }
 0x30d   :  { %v2724_v55 = vpop.f32.mrb[142].mxu0 }
 0x30e   :  { %v3086_v25 = vadd.f32 %v6148_v31, %v2722_v46  ;;  %v2725_v54 = vadd.f32 %v2724_v55, %v5978_v56  ;;  %4011 = vmatpush3.bf16.msra.mxu0 %v4010_v48  ;;  %v2726_v49 = vpop.f32.mrb[143].mxu0 }
 0x30f   :  { %4012 = vmatprep.subr.bf16.mxu0 %v6144_v7 }
 0x310   :  { %v3087_v39 = vadd.f32 %v6149_v20, %v2725_v54  ;;  %v3134_v47 = vmax.f32 %v3086_v25, 0.0 }
 0x312   :  { %v3135_v13 = vmax.f32 %v3087_v39, 0.0 }
 0x313   :  { %v2729_v24 = vpop.f32.mrb[144].mxu0 }
 0x314   :  { %v4013_v45 = vpack.c.bf16 %v3135_v13, %v3134_v47  ;;  %v2730_v57 = vadd.f32 %v2729_v24, %v5984_v0  ;;  %v2731_v42 = vpop.f32.mrb[145].mxu0 }
 0x315   :  { %v2732_v30 = vpop.f32.mrb[146].mxu0 }
 0x316   :  { %v3088_v52 = vadd.f32 %v5854_v4, %v2730_v57  ;;  %v2733_v32 = vadd.f32 %v2732_v30, %v5989_v61  ;;  %4014 = vmatpush3.bf16.msra.mxu0 %v4013_v45  ;;  %v2734_v56 = vpop.f32.mrb[147].mxu0 }
 0x317   :  { %4015 = vmatprep.subr.bf16.mxu0 %v6144_v7 }
 0x318   :  { %v3089_v40 = vadd.f32 %v5868_v9, %v2733_v32  ;;  %v3136_v53 = vmax.f32 %v3088_v52, 0.0 }
 0x31a   :  { %v3137_v28 = vmax.f32 %v3089_v40, 0.0 }
 0x31b   :  { %v2737_v14 = vpop.f32.mrb[148].mxu0 }
 0x31c   :  { %v4016_v51 = vpack.c.bf16 %v3137_v28, %v3136_v53  ;;  %v2738_v44 = vadd.f32 %v2737_v14, %v5995_v22  ;;  %v2739_v15 = vpop.f32.mrb[149].mxu0  ;;  %v3031_v22 = vpop.permute.xlu0 %3030 }
 0x31d   :  { %v2740_v0 = vpop.f32.mrb[150].mxu0 }
 0x31e   :  { %v3090_v34 = vadd.f32 %v5898_v41, %v2738_v44  ;;  %v2741_v4 = vadd.f32 %v2740_v0, %v6000_v43  ;;  %4017 = vmatpush3.bf16.msra.mxu0 %v4016_v51  ;;  %v2742_v61 = vpop.f32.mrb[151].mxu0 }
 0x31f   :  { %4018 = vmatprep.subr.bf16.mxu0 %v6144_v7 }
 0x320   :  { %v3091_v26 = vadd.f32 %v5912_v10, %v2741_v4  ;;  %v3138_v38 = vmax.f32 %v3090_v34, 0.0 }
 0x322   :  { %v3139_v9 = vmax.f32 %v3091_v26, 0.0 }
 0x323   :  { %v2745_v21 = vpop.f32.mrb[152].mxu0 }
 0x324   :  { %v4019_v35 = vpack.c.bf16 %v3139_v9, %v3138_v38  ;;  %v2746_v23 = vadd.f32 %v2745_v21, %v6006_v17  ;;  %v2747_v59 = vpop.f32.mrb[153].mxu0  ;;  %v3041_v17 = vpop.permute.xlu0 %3040 }
 0x325   :  { %v2748_v11 = vpop.f32.mrb[154].mxu0 }
 0x326   :  { %v3092_v33 = vadd.f32 %v3031_v22, %v2746_v23  ;;  %v2749_v41 = vadd.f32 %v2748_v11, %v6011_v5  ;;  %4020 = vmatpush3.bf16.msra.mxu0 %v4019_v35  ;;  %v2750_v43 = vpop.f32.mrb[155].mxu0 }
 0x327   :  { %4021 = vmatprep.subr.bf16.mxu0 %v6144_v7 }
 0x328   :  { %v3093_v6 = vadd.f32 %v3036_v16, %v2749_v41  ;;  %v3140_v63 = vmax.f32 %v3092_v33, 0.0  ;;  %v3151_v55 = vpop.permute.xlu0 %3150 }
 0x32a   :  { %v3141_v10 = vmax.f32 %v3093_v6, 0.0 }
 0x32b   :  { %v2753_v12 = vpop.f32.mrb[156].mxu0 }
 0x32c   :  { %v4022_v37 = vpack.c.bf16 %v3141_v10, %v3140_v63  ;;  %v2754_v2 = vadd.f32 %v2753_v12, %v6017_v36  ;;  %v2755_v60 = vpop.f32.mrb[157].mxu0  ;;  %v3146_v36 = vld [vmem:[%s6088_s7 + $0x10] sm:$0xff] }
 0x32d   :  { %v2756_v27 = vpop.f32.mrb[158].mxu0 }
 0x32e   :  { %v3094_v29 = vadd.f32 %v3041_v17, %v2754_v2  ;;  %v2757_v3 = vadd.f32 %v2756_v27, %v6022_v58  ;;  %4023 = vmatpush3.bf16.msra.mxu0 %v4022_v37  ;;  %v2758_v5 = vpop.f32.mrb[159].mxu0 }
 0x32f   :  { %4024 = vmatprep.subr.bf16.mxu0 %v6144_v7 }
 0x330   :  { %v3095_v62 = vadd.f32 %v3046_v1, %v2757_v3  ;;  %v3142_v19 = vmax.f32 %v3094_v29, 0.0 }
 0x332   :  { %v3143_v8 = vmax.f32 %v3095_v62, 0.0 }
 0x334   :  { %v4025_v18 = vpack.c.bf16 %v3143_v8, %v3142_v19 }
 0x336   :  { %4026 = vmatpush3.bf16.msra.mxu0 %v4025_v18 }
 0x339   :  { %3921 = vmatmul.mubr.f32.vlgmr.msra.gmra.mrb[160].mxu0 %v3146_v36 }
 0x3cd   :  { %v3676_v48 = vpop.f32.mrb[144].mxu1 }
 0x3ce   :  { %v3677_v46 = vpop.f32.mrb[145].mxu1 }
 0x3cf   :  { %v3678_v50 = vadd.f32 %v3677_v46, %v3676_v48 }
 0x3d1   :  { %v3220_v58 = vadd.f32 %v3678_v50, %v3151_v55 }
 0x40c   :  { %v3289_v31 = vpop.f32.mrb[160].mxu0 }
 0x40d   :  { %v3290_v25 = vadd.f32 %v3289_v31, %v3220_v58  ;;  %v3922_v7 = vpop.f32.mrb[161].mxu0 }
 0x40f   :  { %3293 = vst [vmem:[#allocation2] sm:$0xff] %v3290_v25 }
 0x410   :  { %4221 = shalt.err (!%p4218_p4)
}
 0x411   :  { %s4222_s19 = scalar_lea.hbm %s6090_s9, 128 }
 0x412   :  { %p4223_p5 = scmp.ne.s32.totalorder %s6090_s9, %s4222_s19  ;;  %p4226_p6 = scmp.lt.u32.totalorder %s4222_s19, %s6090_s9 }
 0x414   :  { %p4228_p7 = pnand %p4226_p6, %p4223_p5 }
 0x416   :  { %4231 = shalt.err (!%p4228_p7)
}
 0x417   :  { %3303 = dma.vmem_to_hbm [thread:$0]  %s3301_s6, 128, %s6090_s9, [#allocation3]  }
 0x418   :  { %4232 = dma.done.wait [#allocation3], 128  }
 0x419   :  { %4233 = vsyncadd [#allocation3], 4294967168 }
 0x41a   :  { %3307 = vsyncpa [#allocation3], 1 }

</bundles_post_ra>
